<compile_context>
chip_gen: v7x
topology: tpu7x:2x2x1
jax: 0.10.0
libtpu: 0.0.40
codegen_flags: <defaults>
</compile_context>

<pallas_src>
from functools import partial

import jax
import jax.numpy as jnp
from jax.experimental import pallas as pl
from jax.experimental.pallas import tpu as pltpu


# ---------------------------------------------------------------------------
# Fused Pallas kernel
# ---------------------------------------------------------------------------

def _lenet5_kernel(p1_ref, m1_ref, b1_ref, m2_ref, b2_ref,
                   w1_ref, c1_ref, w2_ref, c2_ref, w3_ref, c3_ref,
                   feat_ref, out_ref, pool1_ref):
    """One batch block (bb images).

    p1_ref : (28*bb, 160) bf16  conv1 operand, rows (h, b), cols (kh, w_in)
    m1_ref : (160, 256)  bf16   conv1 band matrix, cols (parity*128 + o*14 + w')
    m2_ref : (5, 84, 256) bf16  conv2 band matrices (one per kernel row kh),
                                rows (c*14 + w_in'), cols (parity*128 + o*5 + w2')
    w1_ref : (5, 80, 128) bf16  fc1 split over the 5 pooled rows h'
    w2/w3  : (128, 128) bf16    fc2 / fc3 (zero padded)
    feat_ref: (10*bb, 256) f32  relu(conv2) pre-pool (last_conv_feat), rows (h, b)
    out_ref : (bb, 128) f32     padded logits
    pool1_ref: (14*bb, 84) f32  VMEM scratch, rows (h', b), cols (c*14 + w')
    """
    bb = out_ref.shape[0]

    # ---- conv1 (single banded MXU matmul) + bias + ReLU ---------------------
    y1 = jnp.dot(p1_ref[...], m1_ref[...], preferred_element_type=jnp.float32)
    y1 = jnp.maximum(y1 + b1_ref[...], 0.0)              # (28*bb, 256)

    # ---- pool1: width pairs are the two 128-lane parity blocks, height pairs
    #      are adjacent bb-row groups (rows ordered (h, b)).
    w1sum = y1[:, 0:84] + y1[:, 128:212]                  # (28*bb, 84)
    for hp in range(14):
        r = 2 * hp * bb
        blk = (w1sum[r:r + bb, :] + w1sum[r + bb:r + 2 * bb, :]) * 0.25
        pool1_ref[pl.ds(hp * bb, bb), :] = blk             # rows (h', b)

    # ---- conv2: 5 accumulating banded matmuls (one per kernel row) ----------
    y2 = jnp.zeros((10 * bb, 256), jnp.float32)
    for kh in range(5):
        a = pool1_ref[pl.ds(kh * bb, 10 * bb), :].astype(m2_ref.dtype)
        y2 = y2 + jnp.dot(a, m2_ref[kh], preferred_element_type=jnp.float32)
    y2 = jnp.maximum(y2 + b2_ref[...], 0.0)               # relu(conv2), rows (h, b)
    feat_ref[...] = y2                                     # last_conv_feat (pre-pool)

    # ---- pool2 folded into fc1 (5 accumulating dots, one per pooled row h') --
    w2sum = y2[:, 0:80] + y2[:, 128:208]                   # (10*bb, 80)
    h1 = jnp.zeros((bb, 128), jnp.float32)
    for hp in range(5):
        r = 2 * hp * bb
        blk = (w2sum[r:r + bb, :] + w2sum[r + bb:r + 2 * bb, :]) * 0.25
        h1 = h1 + jnp.dot(blk.astype(w1_ref.dtype), w1_ref[hp],
                          preferred_element_type=jnp.float32)
    h1 = jnp.maximum(h1 + c1_ref[...], 0.0)

    # ---- fc2 + ReLU, fc3 -----------------------------------------------------
    h2 = jnp.dot(h1.astype(w2_ref.dtype), w2_ref[...],
                 preferred_element_type=jnp.float32)
    h2 = jnp.maximum(h2 + c2_ref[...], 0.0)
    h3 = jnp.dot(h2.astype(w3_ref.dtype), w3_ref[...],
                 preferred_element_type=jnp.float32)
    out_ref[...] = h3 + c3_ref[...]


def _lenet5_pallas(p1, q, nb, bb):
    f32 = jnp.float32
    out_shape = (
        jax.ShapeDtypeStruct((nb, 10 * bb, 256), f32),     # relu(conv2) blocks
        jax.ShapeDtypeStruct((nb * bb, 128), f32),         # padded logits
    )
    in_specs = [
        pl.BlockSpec((None, 28 * bb, 160), lambda i: (i, 0, 0)),   # p1
        pl.BlockSpec((160, 256), lambda i: (0, 0)),                # m1
        pl.BlockSpec((1, 256), lambda i: (0, 0)),                  # b1
        pl.BlockSpec((5, 84, 256), lambda i: (0, 0, 0)),           # m2
        pl.BlockSpec((1, 256), lambda i: (0, 0)),                  # b2
        pl.BlockSpec((5, 80, 128), lambda i: (0, 0, 0)),           # fc1
        pl.BlockSpec((1, 128), lambda i: (0, 0)),                  # fc1 bias
        pl.BlockSpec((128, 128), lambda i: (0, 0)),                # fc2
        pl.BlockSpec((1, 128), lambda i: (0, 0)),                  # fc2 bias
        pl.BlockSpec((128, 128), lambda i: (0, 0)),                # fc3
        pl.BlockSpec((1, 128), lambda i: (0, 0)),                  # fc3 bias
    ]
    out_specs = (
        pl.BlockSpec((None, 10 * bb, 256), lambda i: (i, 0, 0)),
        pl.BlockSpec((bb, 128), lambda i: (i, 0)),
    )
    flops = 2 * nb * bb * (28 * 160 * 256 + 5 * 10 * 84 * 256
                           + 5 * 80 * 128 + 2 * 128 * 128)
    bytes_accessed = int(p1.size * 2
                         + (q["m1"].size + q["m2"].size + q["w1"].size
                            + q["w2"].size + q["w3"].size) * 2
                         + nb * 10 * bb * 256 * 4 + nb * bb * 128 * 4)
    return pl.pallas_call(
        _lenet5_kernel,
        out_shape=out_shape,
        grid=(nb,),
        in_specs=in_specs,
        out_specs=out_specs,
        scratch_shapes=[pltpu.VMEM((14 * bb, 84), jnp.float32)],
        compiler_params=pltpu.CompilerParams(dimension_semantics=("parallel",)),
        cost_estimate=pl.CostEstimate(flops=flops, transcendentals=0,
                                      bytes_accessed=bytes_accessed),
    )(p1, q["m1"], q["b1"], q["m2"], q["b2"],
      q["w1"], q["c1"], q["w2"], q["c2"], q["w3"], q["c3"])


# ---------------------------------------------------------------------------
# Host-side input prep (kernel-row expansion only; everything else is in-kernel)
# ---------------------------------------------------------------------------

def _conv1_rows(x_nchw, bb, nb):
    """(B,1,28,28) -> (nb, 28*bb, 160) bf16 with rows (h, b_local) and columns
    (kh, w_in) over the zero-padded 32-wide input (conv1 padding=2)."""
    B = x_nchw.shape[0]
    x = x_nchw.reshape(B, 28, 28).astype(jnp.float32)
    x = jnp.pad(x, ((0, 0), (2, 2), (2, 2)))                        # (B, 32, 32)
    taps = jnp.stack([x[:, k:k + 28, :] for k in range(5)], axis=2)  # (B,28,5,32)
    p1 = taps.transpose(1, 0, 2, 3).reshape(28, B, 160)              # rows (h, b)
    p1 = jnp.pad(p1, ((0, 0), (0, nb * bb - B), (0, 0)))             # pad batch
    p1 = p1.reshape(28, nb, bb, 160).transpose(1, 0, 2, 3)
    return p1.reshape(nb, 28 * bb, 160).astype(jnp.bfloat16)


# ---------------------------------------------------------------------------
# Parameters
# ---------------------------------------------------------------------------

def init_params(key, num_classes=62):
    ks = jax.random.split(key, 10)

    def uniform(k, shape, fan_in):
        bound = 1.0 / jnp.sqrt(jnp.float32(fan_in))
        return jax.random.uniform(k, shape, jnp.float32, -bound, bound)

    p = {}
    p["conv1_w"] = uniform(ks[0], (6, 1, 5, 5), 1 * 5 * 5)
    p["conv1_b"] = uniform(ks[1], (6,), 1 * 5 * 5)
    p["conv2_w"] = uniform(ks[2], (16, 6, 5, 5), 6 * 5 * 5)
    p["conv2_b"] = uniform(ks[3], (16,), 6 * 5 * 5)
    p["fc1_w"] = uniform(ks[4], (120, 400), 400)
    p["fc1_b"] = uniform(ks[5], (120,), 400)
    p["fc2_w"] = uniform(ks[6], (84, 120), 120)
    p["fc2_b"] = uniform(ks[7], (84,), 120)
    p["fc3_w"] = uniform(ks[8], (num_classes, 84), 84)
    p["fc3_b"] = uniform(ks[9], (num_classes,), 84)
    return p


def prepare_params(p):
    """One-time conversion to the kernel's banded / padded / bf16 layouts."""
    bf16, f32 = jnp.bfloat16, jnp.float32

    # conv1 band matrix: rows (kh*32 + w_in), cols (parity*128 + o*14 + w')
    w1 = p["conv1_w"]                                     # (6, 1, 5, 5)
    ki = jnp.arange(5)[:, None, None, None, None]
    wi = jnp.arange(32)[None, :, None, None, None]
    par = jnp.arange(2)[None, None, :, None, None]
    oc = jnp.arange(6)[None, None, None, :, None]
    wp = jnp.arange(14)[None, None, None, None, :]
    kw = wi - (2 * wp + par)
    vals = jnp.where((kw >= 0) & (kw < 5),
                     w1[oc, 0, ki, jnp.clip(kw, 0, 4)], 0.0)          # (5,32,2,6,14)
    m1 = jnp.zeros((5, 32, 2, 128), f32).at[..., :84].set(vals.reshape(5, 32, 2, 84))
    m1 = m1.reshape(160, 256)
    b1 = jnp.zeros((2, 128), f32).at[:, :84].set(
        jnp.repeat(p["conv1_b"], 14)[None, :]).reshape(1, 256)

    # conv2 band matrices (per kernel row): rows (c*14 + w_in'),
    # cols (parity*128 + o*5 + w2')
    w2 = p["conv2_w"]                                     # (16, 6, 5, 5)
    ki = jnp.arange(5)[:, None, None, None, None, None]
    ci = jnp.arange(6)[None, :, None, None, None, None]
    wi = jnp.arange(14)[None, None, :, None, None, None]
    par = jnp.arange(2)[None, None, None, :, None, None]
    oc = jnp.arange(16)[None, None, None, None, :, None]
    wp = jnp.arange(5)[None, None, None, None, None, :]
    kw = wi - (2 * wp + par)
    vals = jnp.where((kw >= 0) & (kw < 5),
                     w2[oc, ci, ki, jnp.clip(kw, 0, 4)], 0.0)         # (5,6,14,2,16,5)
    m2 = jnp.zeros((5, 6, 14, 2, 128), f32).at[..., :80].set(
        vals.reshape(5, 6, 14, 2, 80)).reshape(5, 84, 256)
    b2 = jnp.zeros((2, 128), f32).at[:, :80].set(
        jnp.repeat(p["conv2_b"], 5)[None, :]).reshape(1, 256)

    # fc1 split over pooled rows h': (5, 80, 128); rows ordered (c*5 + w') to match
    # the kernel's pool2 column order; PyTorch NCHW flatten folded in here.
    f1 = p["fc1_w"].reshape(120, 16, 5, 5).transpose(2, 1, 3, 0).reshape(5, 80, 120)
    w1f = jnp.zeros((5, 80, 128), f32).at[..., :120].set(f1)
    c1f = jnp.zeros((1, 128), f32).at[0, :120].set(p["fc1_b"])

    w2f = jnp.zeros((128, 128), f32).at[:120, :84].set(p["fc2_w"].T)
    c2f = jnp.zeros((1, 128), f32).at[0, :84].set(p["fc2_b"])
    nc = p["fc3_w"].shape[0]
    w3f = jnp.zeros((128, 128), f32).at[:84, :nc].set(p["fc3_w"].T)
    c3f = jnp.zeros((1, 128), f32).at[0, :nc].set(p["fc3_b"])

    return {"m1": m1.astype(bf16), "b1": b1, "m2": m2.astype(bf16), "b2": b2,
            "w1": w1f.astype(bf16), "c1": c1f, "w2": w2f.astype(bf16), "c2": c2f,
            "w3": w3f.astype(bf16), "c3": c3f}


# ---------------------------------------------------------------------------
# Forward pass
# ---------------------------------------------------------------------------

@partial(jax.jit, static_argnames=("num_classes",))
def lenet5_forward(x_nchw, q, num_classes=62):
    B = x_nchw.shape[0]
    # Batch block: multiple of 8 (aligned slices everywhere); batch is zero-padded
    # up to nb*bb, so no awkward full-batch fallback.  >=2 blocks at larger batches
    # lets dimension_semantics=("parallel",) use both v7x TensorCores.
    bb = 8 if B <= 64 else 16
    nb = -(-B // bb)

    p1 = _conv1_rows(x_nchw, bb, nb)
    feat_raw, logits_pad = _lenet5_pallas(p1, q, nb, bb)

    logits = logits_pad[:B, :num_classes]
    # feat blocks: rows (h, b_local), cols (parity*128 + o*5 + w') -> (B,10,10,16) NHWC
    f = feat_raw.reshape(nb, 10, bb, 2, 128)[..., :80]
    f = f.reshape(nb, 10, bb, 2, 16, 5).transpose(0, 2, 1, 5, 3, 4)
    last_conv_feat = f.reshape(nb * bb, 10, 10, 16)[:B]
    return logits, last_conv_feat


# ---------------------------------------------------------------------------
# Pure-JAX f32 reference (PyTorch semantics) for validation
# ---------------------------------------------------------------------------

def reference_forward(x_nchw, p):
    B = x_nchw.shape[0]
    dn = ("NHWC", "HWIO", "NHWC")
    x = jnp.transpose(x_nchw, (0, 2, 3, 1)).astype(jnp.float32)
    c1 = jax.lax.conv_general_dilated(x, jnp.transpose(p["conv1_w"], (2, 3, 1, 0)),
                                      (1, 1), [(2, 2), (2, 2)], dimension_numbers=dn)
    c1 = jax.nn.relu(c1 + p["conv1_b"])
    a1 = c1.reshape(B, 14, 2, 14, 2, 6).mean(axis=(2, 4))
    c2 = jax.lax.conv_general_dilated(a1, jnp.transpose(p["conv2_w"], (2, 3, 1, 0)),
                                      (1, 1), "VALID", dimension_numbers=dn)
    c2 = jax.nn.relu(c2 + p["conv2_b"])
    a2 = c2.reshape(B, 5, 2, 5, 2, 16).mean(axis=(2, 4))
    xf = jnp.transpose(a2, (0, 3, 1, 2)).reshape(B, 16 * 5 * 5)
    h = jax.nn.relu(xf @ p["fc1_w"].T + p["fc1_b"])
    h = jax.nn.relu(h @ p["fc2_w"].T + p["fc2_b"])
    logits = h @ p["fc3_w"].T + p["fc3_b"]
    return logits, c2


# ---------------------------------------------------------------------------
# Main
# ---------------------------------------------------------------------------

if __name__ == "__main__":
    key = jax.random.PRNGKey(0)
    k_params, k_x = jax.random.split(key)

    params = init_params(k_params, num_classes=62)
    qparams = prepare_params(params)        # one-time weight layout / bf16 conversion

    # Small deterministic test (single grid block).
    batch = 2
    x = jax.random.normal(k_x, (batch, 1, 28, 28), dtype=jnp.float32)
    logits, last_conv_feat = lenet5_forward(x, qparams)
    jax.block_until_ready(logits)
    jax.block_until_ready(last_conv_feat)
    assert logits.shape == (batch, 62), logits.shape
    assert last_conv_feat.shape == (batch, 10, 10, 16), last_conv_feat.shape

    ref_logits, ref_feat = reference_forward(x, params)
    d_logits = float(jnp.max(jnp.abs(logits - ref_logits)))
    d_feat = float(jnp.max(jnp.abs(last_conv_feat - ref_feat)))
    assert d_logits < 1e-1, f"logits mismatch: {d_logits}"
    assert d_feat < 5e-2, f"last_conv_feat mismatch: {d_feat}"

    # Odd batch -> exercises the multi-block grid (nb=2) and batch padding/slicing.
    x2 = jax.random.normal(jax.random.PRNGKey(1), (13, 1, 28, 28), dtype=jnp.float32)
    logits2, feat2 = lenet5_forward(x2, qparams)
    jax.block_until_ready(logits2)
    ref_logits2, ref_feat2 = reference_forward(x2, params)
    d2_logits = float(jnp.max(jnp.abs(logits2 - ref_logits2)))
    d2_feat = float(jnp.max(jnp.abs(feat2 - ref_feat2)))
    assert logits2.shape == (13, 62) and feat2.shape == (13, 10, 10, 16)
    assert d2_logits < 1e-1, f"logits mismatch (B=13): {d2_logits}"
    assert d2_feat < 5e-2, f"last_conv_feat mismatch (B=13): {d2_feat}"

    print("KERNEL_OK")
</pallas_src>

<mosaic_0001>
module attributes {stable_mosaic.version = 11 : i64} {
  func.func @_lenet5_kernel(%arg0: i32, %arg1: memref<1x224x160xbf16, #tpu.memory_space<vmem>>, %arg2: memref<160x256xbf16, #tpu.memory_space<vmem>>, %arg3: memref<1x256xf32, #tpu.memory_space<vmem>>, %arg4: memref<5x84x256xbf16, #tpu.memory_space<vmem>>, %arg5: memref<1x256xf32, #tpu.memory_space<vmem>>, %arg6: memref<5x80x128xbf16, #tpu.memory_space<vmem>>, %arg7: memref<1x128xf32, #tpu.memory_space<vmem>>, %arg8: memref<128x128xbf16, #tpu.memory_space<vmem>>, %arg9: memref<1x128xf32, #tpu.memory_space<vmem>>, %arg10: memref<128x128xbf16, #tpu.memory_space<vmem>>, %arg11: memref<1x128xf32, #tpu.memory_space<vmem>>, %arg12: memref<1x80x256xf32, #tpu.memory_space<vmem>>, %arg13: memref<8x128xf32, #tpu.memory_space<vmem>>, %arg14: memref<112x84xf32, #tpu.memory_space<vmem>>) attributes {dimension_semantics = [#tpu.dimension_semantics<parallel>], iteration_bounds = array<i64: 1>, scalar_prefetch = 0 : i64, scratch_operands = 1 : i64, tpu.core_type = #tpu.core_type<tc>, window_params = [{transform_indices = @transform_0, window_bounds = array<i64: 1, 224, 160>}, {pipeline_mode = #tpu.pipeline_mode<synchronous>, transform_indices = @transform_1, window_bounds = array<i64: 160, 256>}, {pipeline_mode = #tpu.pipeline_mode<synchronous>, transform_indices = @transform_2, window_bounds = array<i64: 1, 256>}, {pipeline_mode = #tpu.pipeline_mode<synchronous>, transform_indices = @transform_3, window_bounds = array<i64: 5, 84, 256>}, {pipeline_mode = #tpu.pipeline_mode<synchronous>, transform_indices = @transform_4, window_bounds = array<i64: 1, 256>}, {pipeline_mode = #tpu.pipeline_mode<synchronous>, transform_indices = @transform_5, window_bounds = array<i64: 5, 80, 128>}, {pipeline_mode = #tpu.pipeline_mode<synchronous>, transform_indices = @transform_6, window_bounds = array<i64: 1, 128>}, {pipeline_mode = #tpu.pipeline_mode<synchronous>, transform_indices = @transform_7, window_bounds = array<i64: 128, 128>}, {pipeline_mode = #tpu.pipeline_mode<synchronous>, transform_indices = @transform_8, window_bounds = array<i64: 1, 128>}, {pipeline_mode = #tpu.pipeline_mode<synchronous>, transform_indices = @transform_9, window_bounds = array<i64: 128, 128>}, {pipeline_mode = #tpu.pipeline_mode<synchronous>, transform_indices = @transform_10, window_bounds = array<i64: 1, 128>}, {transform_indices = @transform_11, window_bounds = array<i64: 1, 80, 256>}, {transform_indices = @transform_12, window_bounds = array<i64: 8, 128>}]} {
    %c0 = arith.constant 0 : index
    %c0_0 = arith.constant 0 : index
    %c0_1 = arith.constant 0 : index
    %0 = vector.load %arg1[%c0, %c0_0, %c0_1] : memref<1x224x160xbf16, #tpu.memory_space<vmem>>, vector<1x224x160xbf16>
    %1 = vector.shape_cast %0 : vector<1x224x160xbf16> to vector<224x160xbf16>
    %c0_2 = arith.constant 0 : index
    %c0_3 = arith.constant 0 : index
    %2 = vector.load %arg2[%c0_2, %c0_3] : memref<160x256xbf16, #tpu.memory_space<vmem>>, vector<160x256xbf16>
    %cst = arith.constant dense<0.000000e+00> : vector<224x256xf32>
    %3 = tpu.matmul %1, %2, %cst {dimension_numbers = #tpu.dot_dimension_numbers<[1], [0], [0], [1], [0, 0, 1, 1], [], []>} : vector<224x160xbf16>, vector<160x256xbf16>, vector<224x256xf32> -> vector<224x256xf32>
    %c0_4 = arith.constant 0 : index
    %c0_5 = arith.constant 0 : index
    %4 = vector.load %arg3[%c0_4, %c0_5] : memref<1x256xf32, #tpu.memory_space<vmem>>, vector<1x256xf32>
    %5 = vector.broadcast %4 : vector<1x256xf32> to vector<224x256xf32>
    %6 = arith.addf %3, %5 : vector<224x256xf32>
    %cst_6 = arith.constant 0.000000e+00 : f32
    %7 = vector.broadcast %cst_6 : f32 to vector<224x256xf32>
    %8 = arith.maximumf %6, %7 : vector<224x256xf32>
    %9 = vector.extract_strided_slice %8 {offsets = [0, 0], sizes = [224, 84], strides = [1, 1]} : vector<224x256xf32> to vector<224x84xf32>
    %10 = vector.extract_strided_slice %8 {offsets = [0, 128], sizes = [224, 84], strides = [1, 1]} : vector<224x256xf32> to vector<224x84xf32>
    %11 = arith.addf %9, %10 : vector<224x84xf32>
    %12 = vector.extract_strided_slice %11 {offsets = [0, 0], sizes = [8, 84], strides = [1, 1]} : vector<224x84xf32> to vector<8x84xf32>
    %13 = vector.extract_strided_slice %11 {offsets = [8, 0], sizes = [8, 84], strides = [1, 1]} : vector<224x84xf32> to vector<8x84xf32>
    %14 = arith.addf %12, %13 : vector<8x84xf32>
    %cst_7 = arith.constant 2.500000e-01 : f32
    %15 = vector.broadcast %cst_7 : f32 to vector<8x84xf32>
    %16 = arith.mulf %14, %15 : vector<8x84xf32>
    %c0_8 = arith.constant 0 : index
    %c0_9 = arith.constant 0 : index
    %17 = vector.load %arg14[%c0_8, %c0_9] : memref<112x84xf32, #tpu.memory_space<vmem>>, vector<8x84xf32>
    tpu.vector_store %arg14[%c0_8, %c0_9], %16 {strides = array<i32>} : memref<112x84xf32, #tpu.memory_space<vmem>>, vector<8x84xf32>,
    %18 = vector.extract_strided_slice %11 {offsets = [16, 0], sizes = [8, 84], strides = [1, 1]} : vector<224x84xf32> to vector<8x84xf32>
    %19 = vector.extract_strided_slice %11 {offsets = [24, 0], sizes = [8, 84], strides = [1, 1]} : vector<224x84xf32> to vector<8x84xf32>
    %20 = arith.addf %18, %19 : vector<8x84xf32>
    %cst_10 = arith.constant 2.500000e-01 : f32
    %21 = vector.broadcast %cst_10 : f32 to vector<8x84xf32>
    %22 = arith.mulf %20, %21 : vector<8x84xf32>
    %c8 = arith.constant 8 : index
    %c0_11 = arith.constant 0 : index
    %23 = vector.load %arg14[%c8, %c0_11] : memref<112x84xf32, #tpu.memory_space<vmem>>, vector<8x84xf32>
    tpu.vector_store %arg14[%c8, %c0_11], %22 {strides = array<i32>} : memref<112x84xf32, #tpu.memory_space<vmem>>, vector<8x84xf32>,
    %24 = vector.extract_strided_slice %11 {offsets = [32, 0], sizes = [8, 84], strides = [1, 1]} : vector<224x84xf32> to vector<8x84xf32>
    %25 = vector.extract_strided_slice %11 {offsets = [40, 0], sizes = [8, 84], strides = [1, 1]} : vector<224x84xf32> to vector<8x84xf32>
    %26 = arith.addf %24, %25 : vector<8x84xf32>
    %cst_12 = arith.constant 2.500000e-01 : f32
    %27 = vector.broadcast %cst_12 : f32 to vector<8x84xf32>
    %28 = arith.mulf %26, %27 : vector<8x84xf32>
    %c16 = arith.constant 16 : index
    %c0_13 = arith.constant 0 : index
    %29 = vector.load %arg14[%c16, %c0_13] : memref<112x84xf32, #tpu.memory_space<vmem>>, vector<8x84xf32>
    tpu.vector_store %arg14[%c16, %c0_13], %28 {strides = array<i32>} : memref<112x84xf32, #tpu.memory_space<vmem>>, vector<8x84xf32>,
    %30 = vector.extract_strided_slice %11 {offsets = [48, 0], sizes = [8, 84], strides = [1, 1]} : vector<224x84xf32> to vector<8x84xf32>
    %31 = vector.extract_strided_slice %11 {offsets = [56, 0], sizes = [8, 84], strides = [1, 1]} : vector<224x84xf32> to vector<8x84xf32>
    %32 = arith.addf %30, %31 : vector<8x84xf32>
    %cst_14 = arith.constant 2.500000e-01 : f32
    %33 = vector.broadcast %cst_14 : f32 to vector<8x84xf32>
    %34 = arith.mulf %32, %33 : vector<8x84xf32>
    %c24 = arith.constant 24 : index
    %c0_15 = arith.constant 0 : index
    %35 = vector.load %arg14[%c24, %c0_15] : memref<112x84xf32, #tpu.memory_space<vmem>>, vector<8x84xf32>
    tpu.vector_store %arg14[%c24, %c0_15], %34 {strides = array<i32>} : memref<112x84xf32, #tpu.memory_space<vmem>>, vector<8x84xf32>,
    %36 = vector.extract_strided_slice %11 {offsets = [64, 0], sizes = [8, 84], strides = [1, 1]} : vector<224x84xf32> to vector<8x84xf32>
    %37 = vector.extract_strided_slice %11 {offsets = [72, 0], sizes = [8, 84], strides = [1, 1]} : vector<224x84xf32> to vector<8x84xf32>
    %38 = arith.addf %36, %37 : vector<8x84xf32>
    %cst_16 = arith.constant 2.500000e-01 : f32
    %39 = vector.broadcast %cst_16 : f32 to vector<8x84xf32>
    %40 = arith.mulf %38, %39 : vector<8x84xf32>
    %c32 = arith.constant 32 : index
    %c0_17 = arith.constant 0 : index
    %41 = vector.load %arg14[%c32, %c0_17] : memref<112x84xf32, #tpu.memory_space<vmem>>, vector<8x84xf32>
    tpu.vector_store %arg14[%c32, %c0_17], %40 {strides = array<i32>} : memref<112x84xf32, #tpu.memory_space<vmem>>, vector<8x84xf32>,
    %42 = vector.extract_strided_slice %11 {offsets = [80, 0], sizes = [8, 84], strides = [1, 1]} : vector<224x84xf32> to vector<8x84xf32>
    %43 = vector.extract_strided_slice %11 {offsets = [88, 0], sizes = [8, 84], strides = [1, 1]} : vector<224x84xf32> to vector<8x84xf32>
    %44 = arith.addf %42, %43 : vector<8x84xf32>
    %cst_18 = arith.constant 2.500000e-01 : f32
    %45 = vector.broadcast %cst_18 : f32 to vector<8x84xf32>
    %46 = arith.mulf %44, %45 : vector<8x84xf32>
    %c40 = arith.constant 40 : index
    %c0_19 = arith.constant 0 : index
    %47 = vector.load %arg14[%c40, %c0_19] : memref<112x84xf32, #tpu.memory_space<vmem>>, vector<8x84xf32>
    tpu.vector_store %arg14[%c40, %c0_19], %46 {strides = array<i32>} : memref<112x84xf32, #tpu.memory_space<vmem>>, vector<8x84xf32>,
    %48 = vector.extract_strided_slice %11 {offsets = [96, 0], sizes = [8, 84], strides = [1, 1]} : vector<224x84xf32> to vector<8x84xf32>
    %49 = vector.extract_strided_slice %11 {offsets = [104, 0], sizes = [8, 84], strides = [1, 1]} : vector<224x84xf32> to vector<8x84xf32>
    %50 = arith.addf %48, %49 : vector<8x84xf32>
    %cst_20 = arith.constant 2.500000e-01 : f32
    %51 = vector.broadcast %cst_20 : f32 to vector<8x84xf32>
    %52 = arith.mulf %50, %51 : vector<8x84xf32>
    %c48 = arith.constant 48 : index
    %c0_21 = arith.constant 0 : index
    %53 = vector.load %arg14[%c48, %c0_21] : memref<112x84xf32, #tpu.memory_space<vmem>>, vector<8x84xf32>
    tpu.vector_store %arg14[%c48, %c0_21], %52 {strides = array<i32>} : memref<112x84xf32, #tpu.memory_space<vmem>>, vector<8x84xf32>,
    %54 = vector.extract_strided_slice %11 {offsets = [112, 0], sizes = [8, 84], strides = [1, 1]} : vector<224x84xf32> to vector<8x84xf32>
    %55 = vector.extract_strided_slice %11 {offsets = [120, 0], sizes = [8, 84], strides = [1, 1]} : vector<224x84xf32> to vector<8x84xf32>
    %56 = arith.addf %54, %55 : vector<8x84xf32>
    %cst_22 = arith.constant 2.500000e-01 : f32
    %57 = vector.broadcast %cst_22 : f32 to vector<8x84xf32>
    %58 = arith.mulf %56, %57 : vector<8x84xf32>
    %c56 = arith.constant 56 : index
    %c0_23 = arith.constant 0 : index
    %59 = vector.load %arg14[%c56, %c0_23] : memref<112x84xf32, #tpu.memory_space<vmem>>, vector<8x84xf32>
    tpu.vector_store %arg14[%c56, %c0_23], %58 {strides = array<i32>} : memref<112x84xf32, #tpu.memory_space<vmem>>, vector<8x84xf32>,
    %60 = vector.extract_strided_slice %11 {offsets = [128, 0], sizes = [8, 84], strides = [1, 1]} : vector<224x84xf32> to vector<8x84xf32>
    %61 = vector.extract_strided_slice %11 {offsets = [136, 0], sizes = [8, 84], strides = [1, 1]} : vector<224x84xf32> to vector<8x84xf32>
    %62 = arith.addf %60, %61 : vector<8x84xf32>
    %cst_24 = arith.constant 2.500000e-01 : f32
    %63 = vector.broadcast %cst_24 : f32 to vector<8x84xf32>
    %64 = arith.mulf %62, %63 : vector<8x84xf32>
    %c64 = arith.constant 64 : index
    %c0_25 = arith.constant 0 : index
    %65 = vector.load %arg14[%c64, %c0_25] : memref<112x84xf32, #tpu.memory_space<vmem>>, vector<8x84xf32>
    tpu.vector_store %arg14[%c64, %c0_25], %64 {strides = array<i32>} : memref<112x84xf32, #tpu.memory_space<vmem>>, vector<8x84xf32>,
    %66 = vector.extract_strided_slice %11 {offsets = [144, 0], sizes = [8, 84], strides = [1, 1]} : vector<224x84xf32> to vector<8x84xf32>
    %67 = vector.extract_strided_slice %11 {offsets = [152, 0], sizes = [8, 84], strides = [1, 1]} : vector<224x84xf32> to vector<8x84xf32>
    %68 = arith.addf %66, %67 : vector<8x84xf32>
    %cst_26 = arith.constant 2.500000e-01 : f32
    %69 = vector.broadcast %cst_26 : f32 to vector<8x84xf32>
    %70 = arith.mulf %68, %69 : vector<8x84xf32>
    %c72 = arith.constant 72 : index
    %c0_27 = arith.constant 0 : index
    %71 = vector.load %arg14[%c72, %c0_27] : memref<112x84xf32, #tpu.memory_space<vmem>>, vector<8x84xf32>
    tpu.vector_store %arg14[%c72, %c0_27], %70 {strides = array<i32>} : memref<112x84xf32, #tpu.memory_space<vmem>>, vector<8x84xf32>,
    %72 = vector.extract_strided_slice %11 {offsets = [160, 0], sizes = [8, 84], strides = [1, 1]} : vector<224x84xf32> to vector<8x84xf32>
    %73 = vector.extract_strided_slice %11 {offsets = [168, 0], sizes = [8, 84], strides = [1, 1]} : vector<224x84xf32> to vector<8x84xf32>
    %74 = arith.addf %72, %73 : vector<8x84xf32>
    %cst_28 = arith.constant 2.500000e-01 : f32
    %75 = vector.broadcast %cst_28 : f32 to vector<8x84xf32>
    %76 = arith.mulf %74, %75 : vector<8x84xf32>
    %c80 = arith.constant 80 : index
    %c0_29 = arith.constant 0 : index
    %77 = vector.load %arg14[%c80, %c0_29] : memref<112x84xf32, #tpu.memory_space<vmem>>, vector<8x84xf32>
    tpu.vector_store %arg14[%c80, %c0_29], %76 {strides = array<i32>} : memref<112x84xf32, #tpu.memory_space<vmem>>, vector<8x84xf32>,
    %78 = vector.extract_strided_slice %11 {offsets = [176, 0], sizes = [8, 84], strides = [1, 1]} : vector<224x84xf32> to vector<8x84xf32>
    %79 = vector.extract_strided_slice %11 {offsets = [184, 0], sizes = [8, 84], strides = [1, 1]} : vector<224x84xf32> to vector<8x84xf32>
    %80 = arith.addf %78, %79 : vector<8x84xf32>
    %cst_30 = arith.constant 2.500000e-01 : f32
    %81 = vector.broadcast %cst_30 : f32 to vector<8x84xf32>
    %82 = arith.mulf %80, %81 : vector<8x84xf32>
    %c88 = arith.constant 88 : index
    %c0_31 = arith.constant 0 : index
    %83 = vector.load %arg14[%c88, %c0_31] : memref<112x84xf32, #tpu.memory_space<vmem>>, vector<8x84xf32>
    tpu.vector_store %arg14[%c88, %c0_31], %82 {strides = array<i32>} : memref<112x84xf32, #tpu.memory_space<vmem>>, vector<8x84xf32>,
    %84 = vector.extract_strided_slice %11 {offsets = [192, 0], sizes = [8, 84], strides = [1, 1]} : vector<224x84xf32> to vector<8x84xf32>
    %85 = vector.extract_strided_slice %11 {offsets = [200, 0], sizes = [8, 84], strides = [1, 1]} : vector<224x84xf32> to vector<8x84xf32>
    %86 = arith.addf %84, %85 : vector<8x84xf32>
    %cst_32 = arith.constant 2.500000e-01 : f32
    %87 = vector.broadcast %cst_32 : f32 to vector<8x84xf32>
    %88 = arith.mulf %86, %87 : vector<8x84xf32>
    %c96 = arith.constant 96 : index
    %c0_33 = arith.constant 0 : index
    %89 = vector.load %arg14[%c96, %c0_33] : memref<112x84xf32, #tpu.memory_space<vmem>>, vector<8x84xf32>
    tpu.vector_store %arg14[%c96, %c0_33], %88 {strides = array<i32>} : memref<112x84xf32, #tpu.memory_space<vmem>>, vector<8x84xf32>,
    %90 = vector.extract_strided_slice %11 {offsets = [208, 0], sizes = [8, 84], strides = [1, 1]} : vector<224x84xf32> to vector<8x84xf32>
    %91 = vector.extract_strided_slice %11 {offsets = [216, 0], sizes = [8, 84], strides = [1, 1]} : vector<224x84xf32> to vector<8x84xf32>
    %92 = arith.addf %90, %91 : vector<8x84xf32>
    %cst_34 = arith.constant 2.500000e-01 : f32
    %93 = vector.broadcast %cst_34 : f32 to vector<8x84xf32>
    %94 = arith.mulf %92, %93 : vector<8x84xf32>
    %c104 = arith.constant 104 : index
    %c0_35 = arith.constant 0 : index
    %95 = vector.load %arg14[%c104, %c0_35] : memref<112x84xf32, #tpu.memory_space<vmem>>, vector<8x84xf32>
    tpu.vector_store %arg14[%c104, %c0_35], %94 {strides = array<i32>} : memref<112x84xf32, #tpu.memory_space<vmem>>, vector<8x84xf32>,
    %cst_36 = arith.constant 0.000000e+00 : f32
    %96 = vector.broadcast %cst_36 : f32 to vector<80x256xf32>
    %c0_37 = arith.constant 0 : index
    %c0_38 = arith.constant 0 : index
    %97 = vector.load %arg14[%c0_37, %c0_38] : memref<112x84xf32, #tpu.memory_space<vmem>>, vector<80x84xf32>
    %98 = arith.truncf %97 : vector<80x84xf32> to vector<80x84xbf16>
    %c0_39 = arith.constant 0 : index
    %c0_40 = arith.constant 0 : index
    %c0_41 = arith.constant 0 : index
    %99 = vector.load %arg4[%c0_39, %c0_40, %c0_41] : memref<5x84x256xbf16, #tpu.memory_space<vmem>>, vector<1x84x256xbf16>
    %100 = vector.shape_cast %99 : vector<1x84x256xbf16> to vector<84x256xbf16>
    %cst_42 = arith.constant dense<0.000000e+00> : vector<80x256xf32>
    %101 = tpu.matmul %98, %100, %cst_42 {dimension_numbers = #tpu.dot_dimension_numbers<[1], [0], [0], [1], [0, 0, 1, 1], [], []>} : vector<80x84xbf16>, vector<84x256xbf16>, vector<80x256xf32> -> vector<80x256xf32>
    %102 = arith.addf %96, %101 : vector<80x256xf32>
    %c8_43 = arith.constant 8 : index
    %c0_44 = arith.constant 0 : index
    %103 = vector.load %arg14[%c8_43, %c0_44] : memref<112x84xf32, #tpu.memory_space<vmem>>, vector<80x84xf32>
    %104 = arith.truncf %103 : vector<80x84xf32> to vector<80x84xbf16>
    %c1 = arith.constant 1 : index
    %c0_45 = arith.constant 0 : index
    %c0_46 = arith.constant 0 : index
    %105 = vector.load %arg4[%c1, %c0_45, %c0_46] : memref<5x84x256xbf16, #tpu.memory_space<vmem>>, vector<1x84x256xbf16>
    %106 = vector.shape_cast %105 : vector<1x84x256xbf16> to vector<84x256xbf16>
    %cst_47 = arith.constant dense<0.000000e+00> : vector<80x256xf32>
    %107 = tpu.matmul %104, %106, %cst_47 {dimension_numbers = #tpu.dot_dimension_numbers<[1], [0], [0], [1], [0, 0, 1, 1], [], []>} : vector<80x84xbf16>, vector<84x256xbf16>, vector<80x256xf32> -> vector<80x256xf32>
    %108 = arith.addf %102, %107 : vector<80x256xf32>
    %c16_48 = arith.constant 16 : index
    %c0_49 = arith.constant 0 : index
    %109 = vector.load %arg14[%c16_48, %c0_49] : memref<112x84xf32, #tpu.memory_space<vmem>>, vector<80x84xf32>
    %110 = arith.truncf %109 : vector<80x84xf32> to vector<80x84xbf16>
    %c2 = arith.constant 2 : index
    %c0_50 = arith.constant 0 : index
    %c0_51 = arith.constant 0 : index
    %111 = vector.load %arg4[%c2, %c0_50, %c0_51] : memref<5x84x256xbf16, #tpu.memory_space<vmem>>, vector<1x84x256xbf16>
    %112 = vector.shape_cast %111 : vector<1x84x256xbf16> to vector<84x256xbf16>
    %cst_52 = arith.constant dense<0.000000e+00> : vector<80x256xf32>
    %113 = tpu.matmul %110, %112, %cst_52 {dimension_numbers = #tpu.dot_dimension_numbers<[1], [0], [0], [1], [0, 0, 1, 1], [], []>} : vector<80x84xbf16>, vector<84x256xbf16>, vector<80x256xf32> -> vector<80x256xf32>
    %114 = arith.addf %108, %113 : vector<80x256xf32>
    %c24_53 = arith.constant 24 : index
    %c0_54 = arith.constant 0 : index
    %115 = vector.load %arg14[%c24_53, %c0_54] : memref<112x84xf32, #tpu.memory_space<vmem>>, vector<80x84xf32>
    %116 = arith.truncf %115 : vector<80x84xf32> to vector<80x84xbf16>
    %c3 = arith.constant 3 : index
    %c0_55 = arith.constant 0 : index
    %c0_56 = arith.constant 0 : index
    %117 = vector.load %arg4[%c3, %c0_55, %c0_56] : memref<5x84x256xbf16, #tpu.memory_space<vmem>>, vector<1x84x256xbf16>
    %118 = vector.shape_cast %117 : vector<1x84x256xbf16> to vector<84x256xbf16>
    %cst_57 = arith.constant dense<0.000000e+00> : vector<80x256xf32>
    %119 = tpu.matmul %116, %118, %cst_57 {dimension_numbers = #tpu.dot_dimension_numbers<[1], [0], [0], [1], [0, 0, 1, 1], [], []>} : vector<80x84xbf16>, vector<84x256xbf16>, vector<80x256xf32> -> vector<80x256xf32>
    %120 = arith.addf %114, %119 : vector<80x256xf32>
    %c32_58 = arith.constant 32 : index
    %c0_59 = arith.constant 0 : index
    %121 = vector.load %arg14[%c32_58, %c0_59] : memref<112x84xf32, #tpu.memory_space<vmem>>, vector<80x84xf32>
    %122 = arith.truncf %121 : vector<80x84xf32> to vector<80x84xbf16>
    %c4 = arith.constant 4 : index
    %c0_60 = arith.constant 0 : index
    %c0_61 = arith.constant 0 : index
    %123 = vector.load %arg4[%c4, %c0_60, %c0_61] : memref<5x84x256xbf16, #tpu.memory_space<vmem>>, vector<1x84x256xbf16>
    %124 = vector.shape_cast %123 : vector<1x84x256xbf16> to vector<84x256xbf16>
    %cst_62 = arith.constant dense<0.000000e+00> : vector<80x256xf32>
    %125 = tpu.matmul %122, %124, %cst_62 {dimension_numbers = #tpu.dot_dimension_numbers<[1], [0], [0], [1], [0, 0, 1, 1], [], []>} : vector<80x84xbf16>, vector<84x256xbf16>, vector<80x256xf32> -> vector<80x256xf32>
    %126 = arith.addf %120, %125 : vector<80x256xf32>
    %c0_63 = arith.constant 0 : index
    %c0_64 = arith.constant 0 : index
    %127 = vector.load %arg5[%c0_63, %c0_64] : memref<1x256xf32, #tpu.memory_space<vmem>>, vector<1x256xf32>
    %128 = vector.broadcast %127 : vector<1x256xf32> to vector<80x256xf32>
    %129 = arith.addf %126, %128 : vector<80x256xf32>
    %cst_65 = arith.constant 0.000000e+00 : f32
    %130 = vector.broadcast %cst_65 : f32 to vector<80x256xf32>
    %131 = arith.maximumf %129, %130 : vector<80x256xf32>
    %c0_66 = arith.constant 0 : index
    %c0_67 = arith.constant 0 : index
    %c0_68 = arith.constant 0 : index
    %132 = vector.load %arg12[%c0_66, %c0_67, %c0_68] : memref<1x80x256xf32, #tpu.memory_space<vmem>>, vector<1x80x256xf32>
    %133 = vector.shape_cast %132 : vector<1x80x256xf32> to vector<80x256xf32>
    %134 = vector.shape_cast %131 : vector<80x256xf32> to vector<1x80x256xf32>
    tpu.vector_store %arg12[%c0_66, %c0_67, %c0_68], %134 {strides = array<i32>} : memref<1x80x256xf32, #tpu.memory_space<vmem>>, vector<1x80x256xf32>,
    %135 = vector.extract_strided_slice %131 {offsets = [0, 0], sizes = [80, 80], strides = [1, 1]} : vector<80x256xf32> to vector<80x80xf32>
    %136 = vector.extract_strided_slice %131 {offsets = [0, 128], sizes = [80, 80], strides = [1, 1]} : vector<80x256xf32> to vector<80x80xf32>
    %137 = arith.addf %135, %136 : vector<80x80xf32>
    %cst_69 = arith.constant 0.000000e+00 : f32
    %138 = vector.broadcast %cst_69 : f32 to vector<8x128xf32>
    %139 = vector.extract_strided_slice %137 {offsets = [0, 0], sizes = [8, 80], strides = [1, 1]} : vector<80x80xf32> to vector<8x80xf32>
    %140 = vector.extract_strided_slice %137 {offsets = [8, 0], sizes = [8, 80], strides = [1, 1]} : vector<80x80xf32> to vector<8x80xf32>
    %141 = arith.addf %139, %140 : vector<8x80xf32>
    %cst_70 = arith.constant 2.500000e-01 : f32
    %142 = vector.broadcast %cst_70 : f32 to vector<8x80xf32>
    %143 = arith.mulf %141, %142 : vector<8x80xf32>
    %144 = arith.truncf %143 : vector<8x80xf32> to vector<8x80xbf16>
    %c0_71 = arith.constant 0 : index
    %c0_72 = arith.constant 0 : index
    %c0_73 = arith.constant 0 : index
    %145 = vector.load %arg6[%c0_71, %c0_72, %c0_73] : memref<5x80x128xbf16, #tpu.memory_space<vmem>>, vector<1x80x128xbf16>
    %146 = vector.shape_cast %145 : vector<1x80x128xbf16> to vector<80x128xbf16>
    %cst_74 = arith.constant dense<0.000000e+00> : vector<8x128xf32>
    %147 = tpu.matmul %144, %146, %cst_74 {dimension_numbers = #tpu.dot_dimension_numbers<[1], [0], [0], [1], [0, 0, 1, 1], [], []>} : vector<8x80xbf16>, vector<80x128xbf16>, vector<8x128xf32> -> vector<8x128xf32>
    %148 = arith.addf %138, %147 : vector<8x128xf32>
    %149 = vector.extract_strided_slice %137 {offsets = [16, 0], sizes = [8, 80], strides = [1, 1]} : vector<80x80xf32> to vector<8x80xf32>
    %150 = vector.extract_strided_slice %137 {offsets = [24, 0], sizes = [8, 80], strides = [1, 1]} : vector<80x80xf32> to vector<8x80xf32>
    %151 = arith.addf %149, %150 : vector<8x80xf32>
    %cst_75 = arith.constant 2.500000e-01 : f32
    %152 = vector.broadcast %cst_75 : f32 to vector<8x80xf32>
    %153 = arith.mulf %151, %152 : vector<8x80xf32>
    %154 = arith.truncf %153 : vector<8x80xf32> to vector<8x80xbf16>
    %c1_76 = arith.constant 1 : index
    %c0_77 = arith.constant 0 : index
    %c0_78 = arith.constant 0 : index
    %155 = vector.load %arg6[%c1_76, %c0_77, %c0_78] : memref<5x80x128xbf16, #tpu.memory_space<vmem>>, vector<1x80x128xbf16>
    %156 = vector.shape_cast %155 : vector<1x80x128xbf16> to vector<80x128xbf16>
    %cst_79 = arith.constant dense<0.000000e+00> : vector<8x128xf32>
    %157 = tpu.matmul %154, %156, %cst_79 {dimension_numbers = #tpu.dot_dimension_numbers<[1], [0], [0], [1], [0, 0, 1, 1], [], []>} : vector<8x80xbf16>, vector<80x128xbf16>, vector<8x128xf32> -> vector<8x128xf32>
    %158 = arith.addf %148, %157 : vector<8x128xf32>
    %159 = vector.extract_strided_slice %137 {offsets = [32, 0], sizes = [8, 80], strides = [1, 1]} : vector<80x80xf32> to vector<8x80xf32>
    %160 = vector.extract_strided_slice %137 {offsets = [40, 0], sizes = [8, 80], strides = [1, 1]} : vector<80x80xf32> to vector<8x80xf32>
    %161 = arith.addf %159, %160 : vector<8x80xf32>
    %cst_80 = arith.constant 2.500000e-01 : f32
    %162 = vector.broadcast %cst_80 : f32 to vector<8x80xf32>
    %163 = arith.mulf %161, %162 : vector<8x80xf32>
    %164 = arith.truncf %163 : vector<8x80xf32> to vector<8x80xbf16>
    %c2_81 = arith.constant 2 : index
    %c0_82 = arith.constant 0 : index
    %c0_83 = arith.constant 0 : index
    %165 = vector.load %arg6[%c2_81, %c0_82, %c0_83] : memref<5x80x128xbf16, #tpu.memory_space<vmem>>, vector<1x80x128xbf16>
    %166 = vector.shape_cast %165 : vector<1x80x128xbf16> to vector<80x128xbf16>
    %cst_84 = arith.constant dense<0.000000e+00> : vector<8x128xf32>
    %167 = tpu.matmul %164, %166, %cst_84 {dimension_numbers = #tpu.dot_dimension_numbers<[1], [0], [0], [1], [0, 0, 1, 1], [], []>} : vector<8x80xbf16>, vector<80x128xbf16>, vector<8x128xf32> -> vector<8x128xf32>
    %168 = arith.addf %158, %167 : vector<8x128xf32>
    %169 = vector.extract_strided_slice %137 {offsets = [48, 0], sizes = [8, 80], strides = [1, 1]} : vector<80x80xf32> to vector<8x80xf32>
    %170 = vector.extract_strided_slice %137 {offsets = [56, 0], sizes = [8, 80], strides = [1, 1]} : vector<80x80xf32> to vector<8x80xf32>
    %171 = arith.addf %169, %170 : vector<8x80xf32>
    %cst_85 = arith.constant 2.500000e-01 : f32
    %172 = vector.broadcast %cst_85 : f32 to vector<8x80xf32>
    %173 = arith.mulf %171, %172 : vector<8x80xf32>
    %174 = arith.truncf %173 : vector<8x80xf32> to vector<8x80xbf16>
    %c3_86 = arith.constant 3 : index
    %c0_87 = arith.constant 0 : index
    %c0_88 = arith.constant 0 : index
    %175 = vector.load %arg6[%c3_86, %c0_87, %c0_88] : memref<5x80x128xbf16, #tpu.memory_space<vmem>>, vector<1x80x128xbf16>
    %176 = vector.shape_cast %175 : vector<1x80x128xbf16> to vector<80x128xbf16>
    %cst_89 = arith.constant dense<0.000000e+00> : vector<8x128xf32>
    %177 = tpu.matmul %174, %176, %cst_89 {dimension_numbers = #tpu.dot_dimension_numbers<[1], [0], [0], [1], [0, 0, 1, 1], [], []>} : vector<8x80xbf16>, vector<80x128xbf16>, vector<8x128xf32> -> vector<8x128xf32>
    %178 = arith.addf %168, %177 : vector<8x128xf32>
    %179 = vector.extract_strided_slice %137 {offsets = [64, 0], sizes = [8, 80], strides = [1, 1]} : vector<80x80xf32> to vector<8x80xf32>
    %180 = vector.extract_strided_slice %137 {offsets = [72, 0], sizes = [8, 80], strides = [1, 1]} : vector<80x80xf32> to vector<8x80xf32>
    %181 = arith.addf %179, %180 : vector<8x80xf32>
    %cst_90 = arith.constant 2.500000e-01 : f32
    %182 = vector.broadcast %cst_90 : f32 to vector<8x80xf32>
    %183 = arith.mulf %181, %182 : vector<8x80xf32>
    %184 = arith.truncf %183 : vector<8x80xf32> to vector<8x80xbf16>
    %c4_91 = arith.constant 4 : index
    %c0_92 = arith.constant 0 : index
    %c0_93 = arith.constant 0 : index
    %185 = vector.load %arg6[%c4_91, %c0_92, %c0_93] : memref<5x80x128xbf16, #tpu.memory_space<vmem>>, vector<1x80x128xbf16>
    %186 = vector.shape_cast %185 : vector<1x80x128xbf16> to vector<80x128xbf16>
    %cst_94 = arith.constant dense<0.000000e+00> : vector<8x128xf32>
    %187 = tpu.matmul %184, %186, %cst_94 {dimension_numbers = #tpu.dot_dimension_numbers<[1], [0], [0], [1], [0, 0, 1, 1], [], []>} : vector<8x80xbf16>, vector<80x128xbf16>, vector<8x128xf32> -> vector<8x128xf32>
    %188 = arith.addf %178, %187 : vector<8x128xf32>
    %c0_95 = arith.constant 0 : index
    %c0_96 = arith.constant 0 : index
    %189 = vector.load %arg7[%c0_95, %c0_96] : memref<1x128xf32, #tpu.memory_space<vmem>>, vector<1x128xf32>
    %190 = vector.broadcast %189 : vector<1x128xf32> to vector<8x128xf32>
    %191 = arith.addf %188, %190 : vector<8x128xf32>
    %cst_97 = arith.constant 0.000000e+00 : f32
    %192 = vector.broadcast %cst_97 : f32 to vector<8x128xf32>
    %193 = arith.maximumf %191, %192 : vector<8x128xf32>
    %194 = arith.truncf %193 : vector<8x128xf32> to vector<8x128xbf16>
    %c0_98 = arith.constant 0 : index
    %c0_99 = arith.constant 0 : index
    %195 = vector.load %arg8[%c0_98, %c0_99] : memref<128x128xbf16, #tpu.memory_space<vmem>>, vector<128x128xbf16>
    %cst_100 = arith.constant dense<0.000000e+00> : vector<8x128xf32>
    %196 = tpu.matmul %194, %195, %cst_100 {dimension_numbers = #tpu.dot_dimension_numbers<[1], [0], [0], [1], [0, 0, 1, 1], [], []>} : vector<8x128xbf16>, vector<128x128xbf16>, vector<8x128xf32> -> vector<8x128xf32>
    %c0_101 = arith.constant 0 : index
    %c0_102 = arith.constant 0 : index
    %197 = vector.load %arg9[%c0_101, %c0_102] : memref<1x128xf32, #tpu.memory_space<vmem>>, vector<1x128xf32>
    %198 = vector.broadcast %197 : vector<1x128xf32> to vector<8x128xf32>
    %199 = arith.addf %196, %198 : vector<8x128xf32>
    %cst_103 = arith.constant 0.000000e+00 : f32
    %200 = vector.broadcast %cst_103 : f32 to vector<8x128xf32>
    %201 = arith.maximumf %199, %200 : vector<8x128xf32>
    %202 = arith.truncf %201 : vector<8x128xf32> to vector<8x128xbf16>
    %c0_104 = arith.constant 0 : index
    %c0_105 = arith.constant 0 : index
    %203 = vector.load %arg10[%c0_104, %c0_105] : memref<128x128xbf16, #tpu.memory_space<vmem>>, vector<128x128xbf16>
    %cst_106 = arith.constant dense<0.000000e+00> : vector<8x128xf32>
    %204 = tpu.matmul %202, %203, %cst_106 {dimension_numbers = #tpu.dot_dimension_numbers<[1], [0], [0], [1], [0, 0, 1, 1], [], []>} : vector<8x128xbf16>, vector<128x128xbf16>, vector<8x128xf32> -> vector<8x128xf32>
    %c0_107 = arith.constant 0 : index
    %c0_108 = arith.constant 0 : index
    %205 = vector.load %arg11[%c0_107, %c0_108] : memref<1x128xf32, #tpu.memory_space<vmem>>, vector<1x128xf32>
    %206 = vector.broadcast %205 : vector<1x128xf32> to vector<8x128xf32>
    %207 = arith.addf %204, %206 : vector<8x128xf32>
    %c0_109 = arith.constant 0 : index
    %c0_110 = arith.constant 0 : index
    %208 = vector.load %arg13[%c0_109, %c0_110] : memref<8x128xf32, #tpu.memory_space<vmem>>, vector<8x128xf32>
    tpu.vector_store %arg13[%c0_109, %c0_110], %207 {strides = array<i32>} : memref<8x128xf32, #tpu.memory_space<vmem>>, vector<8x128xf32>,
    return
  }
  func.func @transform_0(%arg0: i32) -> (i32, i32, i32) {
    %c0_i32 = arith.constant 0 : i32
    %c0_i32_0 = arith.constant 0 : i32
    %c0_i32_1 = arith.constant 0 : i32
    return %arg0, %c0_i32, %c0_i32_0 : i32, i32, i32
  }
  func.func @transform_1(%arg0: i32) -> (i32, i32) {
    %c0_i32 = arith.constant 0 : i32
    %c0_i32_0 = arith.constant 0 : i32
    %c0_i32_1 = arith.constant 0 : i32
    return %c0_i32, %c0_i32_0 : i32, i32
  }
  func.func @transform_2(%arg0: i32) -> (i32, i32) {
    %c0_i32 = arith.constant 0 : i32
    %c0_i32_0 = arith.constant 0 : i32
    %c0_i32_1 = arith.constant 0 : i32
    return %c0_i32, %c0_i32_0 : i32, i32
  }
  func.func @transform_3(%arg0: i32) -> (i32, i32, i32) {
    %c0_i32 = arith.constant 0 : i32
    %c0_i32_0 = arith.constant 0 : i32
    %c0_i32_1 = arith.constant 0 : i32
    %c0_i32_2 = arith.constant 0 : i32
    return %c0_i32, %c0_i32_0, %c0_i32_1 : i32, i32, i32
  }
  func.func @transform_4(%arg0: i32) -> (i32, i32) {
    %c0_i32 = arith.constant 0 : i32
    %c0_i32_0 = arith.constant 0 : i32
    %c0_i32_1 = arith.constant 0 : i32
    return %c0_i32, %c0_i32_0 : i32, i32
  }
  func.func @transform_5(%arg0: i32) -> (i32, i32, i32) {
    %c0_i32 = arith.constant 0 : i32
    %c0_i32_0 = arith.constant 0 : i32
    %c0_i32_1 = arith.constant 0 : i32
    %c0_i32_2 = arith.constant 0 : i32
    return %c0_i32, %c0_i32_0, %c0_i32_1 : i32, i32, i32
  }
  func.func @transform_6(%arg0: i32) -> (i32, i32) {
    %c0_i32 = arith.constant 0 : i32
    %c0_i32_0 = arith.constant 0 : i32
    %c0_i32_1 = arith.constant 0 : i32
    return %c0_i32, %c0_i32_0 : i32, i32
  }
  func.func @transform_7(%arg0: i32) -> (i32, i32) {
    %c0_i32 = arith.constant 0 : i32
    %c0_i32_0 = arith.constant 0 : i32
    %c0_i32_1 = arith.constant 0 : i32
    return %c0_i32, %c0_i32_0 : i32, i32
  }
  func.func @transform_8(%arg0: i32) -> (i32, i32) {
    %c0_i32 = arith.constant 0 : i32
    %c0_i32_0 = arith.constant 0 : i32
    %c0_i32_1 = arith.constant 0 : i32
    return %c0_i32, %c0_i32_0 : i32, i32
  }
  func.func @transform_9(%arg0: i32) -> (i32, i32) {
    %c0_i32 = arith.constant 0 : i32
    %c0_i32_0 = arith.constant 0 : i32
    %c0_i32_1 = arith.constant 0 : i32
    return %c0_i32, %c0_i32_0 : i32, i32
  }
  func.func @transform_10(%arg0: i32) -> (i32, i32) {
    %c0_i32 = arith.constant 0 : i32
    %c0_i32_0 = arith.constant 0 : i32
    %c0_i32_1 = arith.constant 0 : i32
    return %c0_i32, %c0_i32_0 : i32, i32
  }
  func.func @transform_11(%arg0: i32) -> (i32, i32, i32) {
    %c0_i32 = arith.constant 0 : i32
    %c0_i32_0 = arith.constant 0 : i32
    %c0_i32_1 = arith.constant 0 : i32
    return %arg0, %c0_i32, %c0_i32_0 : i32, i32, i32
  }
  func.func @transform_12(%arg0: i32) -> (i32, i32) {
    %c0_i32 = arith.constant 0 : i32
    %c0_i32_0 = arith.constant 0 : i32
    return %arg0, %c0_i32 : i32, i32
  }
}

</mosaic_0001>

<bundles_post_ra>
// kernel: lenet5_forward.1
= control target key start
LH: loop header
LB: loop body
LE: loop exit
PB: predicated region body
PF: predicated region fallthrough
CT: control target
= control target key end

     0   :  { %vm327_vm0 = vcmask 261120   ;;  %vm784_vm1 = vcmask 1041408   ;;  %v3138_v62 = vmov 0   ;;  %vm629_vm2 = vcmask 687104   ;;  %s4033_s1 = inlined_call_operand.vmem [shape: bf16[160,256], index: 1, kind: input, shape index: {}]   ;;  %s4034_s0 = inlined_call_operand.vmem [shape: bf16[1,224,160], index: 0, kind: input, shape index: {}]   ;;  %s4035_s3 = inlined_call_operand.vmem [shape: bf16[5,84,256], index: 3, kind: input, shape index: {}]   ;;  %s4036_s2 = inlined_call_operand.vmem [shape: f32[1,256], index: 2, kind: input, shape index: {}]   ;;  %s4037_s5 = inlined_call_operand.vmem [shape: bf16[5,80,128], index: 5, kind: input, shape index: {}]   ;;  %s4038_s4 = inlined_call_operand.vmem [shape: f32[1,256], index: 4, kind: input, shape index: {}]   ;;  %s4039_s11 = inlined_call_operand.vmem [shape: f32[1,80,256], index: 11, kind: output, shape index: {0}]   ;;  %s4040_s7 = inlined_call_operand.vmem [shape: bf16[128,128], index: 7, kind: input, shape index: {}]   ;;  %s4041_s9 = inlined_call_operand.vmem [shape: bf16[128,128], index: 9, kind: input, shape index: {}]   ;;  %s4042_s6 = inlined_call_operand.vmem [shape: f32[1,128], index: 6, kind: input, shape index: {}]   ;;  %s4043_s8 = inlined_call_operand.vmem [shape: f32[1,128], index: 8, kind: input, shape index: {}]   ;;  %s4044_s10 = inlined_call_operand.vmem [shape: f32[1,128], index: 10, kind: input, shape index: {}]   ;;  %s4045_s12 = inlined_call_operand.vmem [shape: f32[8,128], index: 12, kind: output, shape index: {1}]  }
   0x1   :  { %v2940_v0 = vld [vmem:[%s4033_s1 + $0x4] ss:$8 sps:$4 sm:$0xff]   ;;  %v2942_v1 = vld [vmem:[%s4033_s1] ss:$8 sps:$4 sm:$0xff]   ;;  %v2943_v2 = vld [vmem:[%s4033_s1 + $0x14] ss:$8 sps:$4 sm:$0xff]   ;;  %823 = vmatprep.mubr.bf16.mxu1 %v3138_v62 }
   0x2   :  { %370 = vmatprep.subr.bf16.mxu0 %v2940_v0  ;;  %v2945_v3 = vld [vmem:[%s4033_s1 + $0x10] ss:$8 sps:$4 sm:$0xff]   ;;  %v2946_v4 = vld [vmem:[%s4033_s1 + $0x24] ss:$8 sps:$4 sm:$0xff]   ;;  %v2948_v5 = vld [vmem:[%s4033_s1 + $0x20] ss:$8 sps:$4 sm:$0xff]   ;;  %v91_v0 = vlaneseq }
   0x3   :  { %371 = vmatpush1.bf16.msra.mxu0 %v2942_v1  ;;  %v2949_v6 = vld [vmem:[%s4033_s1 + $0x34] ss:$8 sps:$4 sm:$0xff]   ;;  %v2951_v7 = vld [vmem:[%s4033_s1 + $0x30] ss:$8 sps:$4 sm:$0xff]   ;;  %v2952_v8 = vld [vmem:[%s4033_s1 + $0x44] ss:$8 sps:$4 sm:$0xff]  }
   0x4   :  { %372 = vmatprep.subr.bf16.mxu0 %v2943_v2  ;;  %v2972_v9 = vld [vmem:[%s4034_s0 + $0x4] ss:$8 sps:$4 sm:$0xff]   ;;  %v2954_v10 = vld [vmem:[%s4033_s1 + $0x40] ss:$8 sps:$4 sm:$0xff]   ;;  %v2955_v11 = vld [vmem:[%s4033_s1 + $0x54] ss:$8 sps:$4 sm:$0xff]  }
   0x5   :  { %2462 = vmatprep.mubr.msk.bf16.mxu0 %vm327_vm0, %v2972_v9  ;;  %v2957_v12 = vld [vmem:[%s4033_s1 + $0x50] ss:$8 sps:$4 sm:$0xff]   ;;  %v2958_v13 = vld [vmem:[%s4033_s1 + $0x64] ss:$8 sps:$4 sm:$0xff]   ;;  %v2960_v14 = vld [vmem:[%s4033_s1 + $0x60] ss:$8 sps:$4 sm:$0xff]  }
   0x6   :  { %v2961_v15 = vld [vmem:[%s4033_s1 + $0x74] ss:$8 sps:$4 sm:$0xff]   ;;  %v2963_v16 = vld [vmem:[%s4033_s1 + $0x70] ss:$8 sps:$4 sm:$0xff]   ;;  %v2964_v17 = vld [vmem:[%s4033_s1 + $0x84] ss:$8 sps:$4 sm:$0xff]  }
   0x7   :  { %373 = vmatpush1.bf16.msra.mxu0 %v2945_v3  ;;  %v2966_v18 = vld [vmem:[%s4033_s1 + $0x80] ss:$8 sps:$4 sm:$0xff]   ;;  %v2967_v19 = vld [vmem:[%s4033_s1 + $0x94] ss:$8 sps:$4 sm:$0xff]   ;;  %v2969_v20 = vld [vmem:[%s4033_s1 + $0x90] ss:$8 sps:$4 sm:$0xff]  }
   0x8   :  { %374 = vmatprep.subr.bf16.mxu0 %v2946_v4  ;;  %v2970_v21 = vld [vmem:[%s4034_s0] ss:$8 sps:$4 sm:$0xff]   ;;  %v2973_v22 = vld [vmem:[%s4034_s0 + $0x14] ss:$8 sps:$4 sm:$0xff]   ;;  %v2975_v23 = vld [vmem:[%s4034_s0 + $0x10] ss:$8 sps:$4 sm:$0xff]  }
   0x9   :  { %v2976_v24 = vld [vmem:[%s4034_s0 + $0x24] ss:$8 sps:$4 sm:$0xff]   ;;  %v2978_v25 = vld [vmem:[%s4034_s0 + $0x20] ss:$8 sps:$4 sm:$0xff]   ;;  %v2979_v26 = vld [vmem:[%s4034_s0 + $0x34] ss:$8 sps:$4 sm:$0xff]  }
   0xa   :  { %v2981_v27 = vld [vmem:[%s4034_s0 + $0x30] ss:$8 sps:$4 sm:$0xff]   ;;  %v2982_v28 = vld [vmem:[%s4034_s0 + $0x44] ss:$8 sps:$4 sm:$0xff]   ;;  %v2984_v29 = vld [vmem:[%s4034_s0 + $0x40] ss:$8 sps:$4 sm:$0xff]  }
   0xb   :  { %375 = vmatpush1.bf16.msra.mxu0 %v2948_v5  ;;  %v2985_v30 = vld [vmem:[%s4034_s0 + $0x54] ss:$8 sps:$4 sm:$0xff]   ;;  %v2987_v31 = vld [vmem:[%s4034_s0 + $0x50] ss:$8 sps:$4 sm:$0xff]   ;;  %v2988_v32 = vld [vmem:[%s4034_s0 + $0x64] ss:$8 sps:$4 sm:$0xff]  }
   0xc   :  { %376 = vmatprep.subr.bf16.mxu0 %v2949_v6  ;;  %v2990_v33 = vld [vmem:[%s4034_s0 + $0x60] ss:$8 sps:$4 sm:$0xff]   ;;  %v2991_v34 = vld [vmem:[%s4034_s0 + $0x74] ss:$8 sps:$4 sm:$0xff]   ;;  %v2993_v35 = vld [vmem:[%s4034_s0 + $0x70] ss:$8 sps:$4 sm:$0xff]  }
   0xd   :  { %v2994_v36 = vld [vmem:[%s4034_s0 + $0x84] ss:$8 sps:$4 sm:$0xff]   ;;  %v2996_v37 = vld [vmem:[%s4034_s0 + $0x80] ss:$8 sps:$4 sm:$0xff]   ;;  %v2997_v38 = vld [vmem:[%s4034_s0 + $0x94] ss:$8 sps:$4 sm:$0xff]  }
   0xe   :  { %v2999_v39 = vld [vmem:[%s4034_s0 + $0x90] ss:$8 sps:$4 sm:$0xff]   ;;  %v3000_v40 = vld [vmem:[%s4034_s0 + $0xa4] ss:$8 sps:$4 sm:$0xff]   ;;  %v3002_v41 = vld [vmem:[%s4034_s0 + $0xa0] ss:$8 sps:$4 sm:$0xff]  }
   0xf   :  { %377 = vmatpush1.bf16.msra.mxu0 %v2951_v7  ;;  %v3003_v42 = vld [vmem:[%s4034_s0 + $0xb4] ss:$8 sps:$4 sm:$0xff]   ;;  %v3005_v43 = vld [vmem:[%s4034_s0 + $0xb0] ss:$8 sps:$4 sm:$0xff]   ;;  %v3006_v44 = vld [vmem:[%s4034_s0 + $0xc4] ss:$8 sps:$4 sm:$0xff]  }
  0x10   :  { %378 = vmatprep.subr.bf16.mxu0 %v2952_v8  ;;  %v3008_v45 = vld [vmem:[%s4034_s0 + $0xc0] ss:$8 sps:$4 sm:$0xff]   ;;  %v3009_v46 = vld [vmem:[%s4034_s0 + $0xd4] ss:$8 sps:$4 sm:$0xff]   ;;  %v3011_v48 = vld [vmem:[%s4034_s0 + $0xd0] ss:$8 sps:$4 sm:$0xff]  }
  0x11   :  { %v3012_v47 = vld [vmem:[%s4035_s3 + $0x5c] ss:$8 sps:$4 sm:$0xff]   ;;  %v3014_v49 = vld [vmem:[%s4035_s3 + $0x58] ss:$8 sps:$4 sm:$0xff]   ;;  %v3015_v50 = vld [vmem:[%s4035_s3 + $0x6c] ss:$8 sps:$4 sm:$0xff]  }
  0x12   :  { %791 = vmatprep.subr.bf16.mxu1 %v3012_v47  ;;  %v3017_v51 = vld [vmem:[%s4035_s3 + $0x68] ss:$8 sps:$4 sm:$0xff]   ;;  %v3018_v52 = vld [vmem:[%s4035_s3 + $0x7c] ss:$8 sps:$4 sm:$0xff]   ;;  %v3020_v53 = vld [vmem:[%s4035_s3 + $0x78] ss:$8 sps:$4 sm:$0xff]  }
  0x13   :  { %379 = vmatpush1.bf16.msra.mxu0 %v2954_v10  ;;  %792 = vmatpush1.bf16.msra.mxu1 %v3014_v49  ;;  %v3021_v54 = vld [vmem:[%s4035_s3 + $0x8c] ss:$8 sps:$4 sm:$0xff]   ;;  %v3023_v55 = vld [vmem:[%s4035_s3 + $0x88] ss:$8 sps:$4 sm:$0xff]   ;;  %v3024_v56 = vld [vmem:[%s4035_s3 + $0x9c] ss:$8 sps:$4 sm:$0xff]  }
  0x14   :  { %380 = vmatprep.subr.bf16.mxu0 %v2955_v11  ;;  %793 = vmatprep.subr.bf16.mxu1 %v3015_v50  ;;  %v3026_v57 = vld [vmem:[%s4035_s3 + $0x98] ss:$8 sps:$4 sm:$0xff]   ;;  %v2486_v58 = vld [vmem:[%s4035_s3 + $0xa8] sm:$0x33]  ;;  %v3403_v1 = vshrl.u32 %v91_v0, 7  ;;  %vm3140_vm3 = vmmov 0  }
  0x15   :  { %v2498_v59 = vcombine.high %v2486_v58, %v2486_v58  ;;  %v2497_v60 = vcombine.low %v2486_v58, %v2486_v58  ;;  %v3031_v63 = vld [vmem:[%s4035_s3 + $0x4] ss:$8 sps:$4 sm:$0xff]   ;;  %v89_v3 = vld [vmem:[%s4036_s2] sm:$0x3]  ;;  %vm1790_vm4 = vcmask 654336  }
  0x16   :  { %v93_v2 = vsub.s32 0, %v3403_v1  ;;  %v97_v4 = vsub.s32 1, %v3403_v1 }
  0x17   :  { %381 = vmatpush1.bf16.msra.mxu0 %v2957_v12  ;;  %794 = vmatpush1.bf16.msra.mxu1 %v3017_v51  ;;  %v786_v61 = vsel %vm784_vm1, %v2497_v60, 0 }
  0x18   :  { %382 = vmatprep.subr.bf16.mxu0 %v2958_v13  ;;  %795 = vmatprep.subr.bf16.mxu1 %v3018_v52  ;;  %v3412_v5 = vrot.slane %v89_v3, %v93_v2  ;;  %v3416_v6 = vrot.slane %v89_v3, %v97_v4 }
  0x1b   :  { %383 = vmatpush1.bf16.msra.mxu0 %v2960_v14  ;;  %796 = vmatpush1.bf16.msra.mxu1 %v3020_v53 }
  0x1c   :  { %384 = vmatprep.subr.bf16.mxu0 %v2961_v15  ;;  %797 = vmatprep.subr.bf16.mxu1 %v3021_v54 }
  0x1f   :  { %385 = vmatpush1.bf16.msra.mxu0 %v2963_v16  ;;  %798 = vmatpush1.bf16.msra.mxu1 %v3023_v55 }
  0x20   :  { %386 = vmatprep.subr.bf16.mxu0 %v2964_v17  ;;  %799 = vmatprep.subr.bf16.mxu1 %v3024_v56 }
  0x23   :  { %387 = vmatpush1.bf16.msra.mxu0 %v2966_v18  ;;  %800 = vmatpush1.bf16.msra.mxu1 %v3026_v57 }
  0x24   :  { %388 = vmatprep.subr.bf16.mxu0 %v2967_v19  ;;  %2499 = vmatprep.subr.msk.bf16.mxu1 %vm784_vm1, %v2498_v59 }
  0x27   :  { %389 = vmatpush1.bf16.msra.mxu0 %v2969_v20  ;;  %802 = vmatpush1.bf16.msra.mxu1 %v786_v61 }
  0x28   :  { %950 = vmatprep.subr.bf16.mxu1 %v3031_v63 }
  0x2a   :  { %403 = vmatmul.mubr.bf16.vlgmr.msra.gmra.mrb[0].mxu0 %v2970_v21 }
  0x2b   :  { %2463 = vmatprep.mubr.msk.bf16.mxu0 %vm327_vm0, %v2973_v22 }
  0x32   :  { %413 = vmatmul.mubr.bf16.gmra.mrb[4].mxu0 %v2975_v23 }
  0x33   :  { %2464 = vmatprep.mubr.msk.bf16.mxu0 %vm327_vm0, %v2976_v24 }
  0x3a   :  { %423 = vmatmul.mubr.bf16.gmra.mrb[8].mxu0 %v2978_v25 }
  0x3b   :  { %2465 = vmatprep.mubr.msk.bf16.mxu0 %vm327_vm0, %v2979_v26 }
  0x42   :  { %433 = vmatmul.mubr.bf16.gmra.mrb[12].mxu0 %v2981_v27 }
  0x43   :  { %2466 = vmatprep.mubr.msk.bf16.mxu0 %vm327_vm0, %v2982_v28 }
  0x4a   :  { %443 = vmatmul.mubr.bf16.gmra.mrb[16].mxu0 %v2984_v29 }
  0x4b   :  { %2467 = vmatprep.mubr.msk.bf16.mxu0 %vm327_vm0, %v2985_v30 }
  0x52   :  { %453 = vmatmul.mubr.bf16.gmra.mrb[20].mxu0 %v2987_v31 }
  0x53   :  { %2468 = vmatprep.mubr.msk.bf16.mxu0 %vm327_vm0, %v2988_v32 }
  0x5a   :  { %463 = vmatmul.mubr.bf16.gmra.mrb[24].mxu0 %v2990_v33 }
  0x5b   :  { %2469 = vmatprep.mubr.msk.bf16.mxu0 %vm327_vm0, %v2991_v34 }
  0x62   :  { %473 = vmatmul.mubr.bf16.gmra.mrb[28].mxu0 %v2993_v35 }
  0x63   :  { %2470 = vmatprep.mubr.msk.bf16.mxu0 %vm327_vm0, %v2994_v36 }
  0x6a   :  { %483 = vmatmul.mubr.bf16.gmra.mrb[32].mxu0 %v2996_v37 }
  0x6b   :  { %2471 = vmatprep.mubr.msk.bf16.mxu0 %vm327_vm0, %v2997_v38 }
  0x72   :  { %493 = vmatmul.mubr.bf16.gmra.mrb[36].mxu0 %v2999_v39 }
  0x73   :  { %2472 = vmatprep.mubr.msk.bf16.mxu0 %vm327_vm0, %v3000_v40 }
  0x7a   :  { %503 = vmatmul.mubr.bf16.gmra.mrb[40].mxu0 %v3002_v41 }
  0x7b   :  { %2473 = vmatprep.mubr.msk.bf16.mxu0 %vm327_vm0, %v3003_v42 }
  0x82   :  { %513 = vmatmul.mubr.bf16.gmra.mrb[44].mxu0 %v3005_v43 }
  0x83   :  { %2474 = vmatprep.mubr.msk.bf16.mxu0 %vm327_vm0, %v3006_v44 }
  0x8a   :  { %523 = vmatmul.mubr.bf16.gmra.mrb[48].mxu0 %v3008_v45 }
  0x8b   :  { %2475 = vmatprep.mubr.msk.bf16.mxu0 %vm327_vm0, %v3009_v46 }
  0x92   :  { %533 = vmatmul.mubr.bf16.gmra.mrb[52].mxu0 %v3011_v48 }
  0xfd   :  { %v404_v7 = vpop.f32.mrb[0].mxu0 }
  0xfe   :  { %v405_v8 = vadd.f32 %v404_v7, %v3412_v5  ;;  %v406_v9 = vpop.f32.mrb[1].mxu0 }
  0xff   :  { %v407_v10 = vadd.f32 %v406_v9, %v3416_v6  ;;  %v408_v11 = vpop.f32.mrb[2].mxu0 }
 0x100   :  { %v543_v12 = vmax.f32 %v405_v8, 0.0  ;;  %v409_v13 = vadd.f32 %v408_v11, %v3412_v5  ;;  %v410_v14 = vpop.f32.mrb[3].mxu0 }
 0x101   :  { %v544_v15 = vmax.f32 %v407_v10, 0.0  ;;  %v411_v16 = vadd.f32 %v410_v14, %v3416_v6 }
 0x102   :  { %v545_v17 = vmax.f32 %v409_v13, 0.0 }
 0x103   :  { %v599_v18 = vadd.f32 %v544_v15, %v543_v12  ;;  %v546_v19 = vmax.f32 %v411_v16, 0.0 }
 0x105   :  { %v600_v20 = vadd.f32 %v546_v19, %v545_v17  ;;  %v414_v21 = vpop.f32.mrb[4].mxu0 }
 0x106   :  { %v415_v22 = vadd.f32 %v414_v21, %v3412_v5  ;;  %v416_v23 = vpop.f32.mrb[5].mxu0 }
 0x107   :  { %v627_v24 = vadd.f32 %v600_v20, %v599_v18  ;;  %v417_v25 = vadd.f32 %v416_v23, %v3416_v6  ;;  %v418_v26 = vpop.f32.mrb[6].mxu0 }
 0x108   :  { %v547_v27 = vmax.f32 %v415_v22, 0.0  ;;  %v419_v28 = vadd.f32 %v418_v26, %v3412_v5  ;;  %v420_v29 = vpop.f32.mrb[7].mxu0  ;;  %v3029_v26 = vld [vmem:[%s4035_s3] ss:$8 sps:$4 sm:$0xff]  }
 0x109   :  { %v628_v30 = vmul.f32 0.25, %v627_v24  ;;  %v548_v31 = vmax.f32 %v417_v25, 0.0  ;;  %v421_v32 = vadd.f32 %v420_v29, %v3416_v6 }
 0x10a   :  { %v549_v33 = vmax.f32 %v419_v28, 0.0 }
 0x10b   :  { %630 = vst.msk [vmem:[#allocation2] sm:$0xff] %vm629_vm2, %v628_v30  ;;  %v601_v34 = vadd.f32 %v548_v31, %v547_v27  ;;  %v550_v35 = vmax.f32 %v421_v32, 0.0  ;;  %v3034_v30 = vld [vmem:[%s4035_s3 + $0x14] ss:$8 sps:$4 sm:$0xff]  }
 0x10d   :  { %v602_v36 = vadd.f32 %v550_v35, %v549_v33  ;;  %v424_v37 = vpop.f32.mrb[8].mxu0  ;;  %v3032_v35 = vld [vmem:[%s4035_s3 + $0x10] ss:$8 sps:$4 sm:$0xff]  }
 0x10e   :  { %v425_v38 = vadd.f32 %v424_v37, %v3412_v5  ;;  %v426_v39 = vpop.f32.mrb[9].mxu0 }
 0x10f   :  { %v631_v40 = vadd.f32 %v602_v36, %v601_v34  ;;  %v427_v41 = vadd.f32 %v426_v39, %v3416_v6  ;;  %v428_v42 = vpop.f32.mrb[10].mxu0  ;;  %v3037_v39 = vld [vmem:[%s4035_s3 + $0x24] ss:$8 sps:$4 sm:$0xff]  }
 0x110   :  { %v551_v43 = vmax.f32 %v425_v38, 0.0  ;;  %v429_v44 = vadd.f32 %v428_v42, %v3412_v5  ;;  %v430_v45 = vpop.f32.mrb[11].mxu0 }
 0x111   :  { %v632_v46 = vmul.f32 0.25, %v631_v40  ;;  %v552_v47 = vmax.f32 %v427_v41, 0.0  ;;  %v431_v48 = vadd.f32 %v430_v45, %v3416_v6 }
 0x112   :  { %v553_v49 = vmax.f32 %v429_v44, 0.0 }
 0x113   :  { %633 = vst.msk [vmem:[#allocation2 + $0x8] sm:$0xff] %vm629_vm2, %v632_v46  ;;  %v603_v50 = vadd.f32 %v552_v47, %v551_v43  ;;  %v554_v51 = vmax.f32 %v431_v48, 0.0  ;;  %v3035_v48 = vld [vmem:[%s4035_s3 + $0x20] ss:$8 sps:$4 sm:$0xff]  }
 0x115   :  { %v604_v52 = vadd.f32 %v554_v51, %v553_v49  ;;  %v434_v53 = vpop.f32.mrb[12].mxu0  ;;  %v3040_v51 = vld [vmem:[%s4035_s3 + $0x34] ss:$8 sps:$4 sm:$0xff]  }
 0x116   :  { %v435_v54 = vadd.f32 %v434_v53, %v3412_v5  ;;  %v436_v55 = vpop.f32.mrb[13].mxu0 }
 0x117   :  { %v634_v56 = vadd.f32 %v604_v52, %v603_v50  ;;  %v437_v57 = vadd.f32 %v436_v55, %v3416_v6  ;;  %v438_v58 = vpop.f32.mrb[14].mxu0 }
 0x118   :  { %v555_v59 = vmax.f32 %v435_v54, 0.0  ;;  %v439_v60 = vadd.f32 %v438_v58, %v3412_v5  ;;  %v440_v61 = vpop.f32.mrb[15].mxu0 }
 0x119   :  { %v635_v63 = vmul.f32 0.25, %v634_v56  ;;  %v556_v0 = vmax.f32 %v437_v57, 0.0  ;;  %v441_v3 = vadd.f32 %v440_v61, %v3416_v6  ;;  %v3038_v57 = vld [vmem:[%s4035_s3 + $0x30] ss:$8 sps:$4 sm:$0xff]   ;;  %v3043_v61 = vld [vmem:[%s4035_s3 + $0x44] ss:$8 sps:$4 sm:$0xff]  }
 0x11a   :  { %v557_v7 = vmax.f32 %v439_v60, 0.0  ;;  %v3441_v24 = vld [vmem:[#allocation2 + $0x8] sm:$0xff] }
 0x11b   :  { %636 = vst.msk [vmem:[#allocation2 + $0x10] sm:$0xff] %vm629_vm2, %v635_v63  ;;  %v605_v8 = vadd.f32 %v556_v0, %v555_v59  ;;  %v558_v9 = vmax.f32 %v441_v3, 0.0  ;;  %v695_v63 = vld [vmem:[%s4035_s3 + $0x50] sm:$0x33] }
 0x11d   :  { %v606_v10 = vadd.f32 %v558_v9, %v557_v7  ;;  %v444_v11 = vpop.f32.mrb[16].mxu0 }
 0x11e   :  { %v445_v12 = vadd.f32 %v444_v11, %v3412_v5  ;;  %v446_v13 = vpop.f32.mrb[17].mxu0 }
 0x11f   :  { %v637_v14 = vadd.f32 %v606_v10, %v605_v8  ;;  %v447_v15 = vadd.f32 %v446_v13, %v3416_v6  ;;  %v448_v16 = vpop.f32.mrb[18].mxu0  ;;  %v3041_v13 = vld [vmem:[%s4035_s3 + $0x40] ss:$8 sps:$4 sm:$0xff]  }
 0x120   :  { %v559_v17 = vmax.f32 %v445_v12, 0.0  ;;  %v449_v18 = vadd.f32 %v448_v16, %v3412_v5  ;;  %v450_v19 = vpop.f32.mrb[19].mxu0 }
 0x121   :  { %v638_v20 = vmul.f32 0.25, %v637_v14  ;;  %v560_v21 = vmax.f32 %v447_v15, 0.0  ;;  %v451_v22 = vadd.f32 %v450_v19, %v3416_v6  ;;  %v2516_v14 = vcombine.high %v695_v63, %v695_v63 }
 0x122   :  { %v561_v23 = vmax.f32 %v449_v18, 0.0  ;;  %v672_v25 = vld [vmem:[#allocation2 + $0x10] sm:$0xff]  ;;  %v2515_v18 = vcombine.low %v695_v63, %v695_v63 }
 0x123   :  { %639 = vst.msk [vmem:[#allocation2 + $0x18] sm:$0xff] %vm629_vm2, %v638_v20  ;;  %v607_v27 = vadd.f32 %v560_v21, %v559_v17  ;;  %v562_v28 = vmax.f32 %v451_v22, 0.0  ;;  %v697_v29 = vpack.c.bf16 %v672_v25, %v3441_v24 }
 0x125   :  { %v608_v31 = vadd.f32 %v562_v28, %v561_v23  ;;  %v454_v32 = vpop.f32.mrb[20].mxu0  ;;  %2500 = vmatmul.mubr.msk.bf16.vlgmr.msra.gmra.mrb[0].mxu1 %vm629_vm2, %v697_v29  ;;  %v3048_v28 = vld [vmem:[%s4035_s3 + $0xb4] ss:$8 sps:$4 sm:$0xff]  }
 0x126   :  { %v455_v33 = vadd.f32 %v454_v32, %v3412_v5  ;;  %v456_v34 = vpop.f32.mrb[21].mxu0  ;;  %833 = vmatprep.mubr.bf16.mxu1 %v3138_v62  ;;  %951 = vmatpush1.bf16.msra.mxu1 %v3029_v26 }
 0x127   :  { %v640_v36 = vadd.f32 %v608_v31, %v607_v27  ;;  %v457_v37 = vadd.f32 %v456_v34, %v3416_v6  ;;  %v458_v38 = vpop.f32.mrb[22].mxu0  ;;  %952 = vmatprep.subr.bf16.mxu1 %v3034_v30  ;;  %v945_v27 = vsel %vm784_vm1, %v2515_v18, 0 }
 0x128   :  { %v563_v40 = vmax.f32 %v455_v33, 0.0  ;;  %v459_v41 = vadd.f32 %v458_v38, %v3412_v5  ;;  %v460_v42 = vpop.f32.mrb[23].mxu0 }
 0x129   :  { %v641_v43 = vmul.f32 0.25, %v640_v36  ;;  %v564_v44 = vmax.f32 %v457_v37, 0.0  ;;  %v461_v45 = vadd.f32 %v460_v42, %v3416_v6 }
 0x12a   :  { %v565_v46 = vmax.f32 %v459_v41, 0.0  ;;  %v673_v47 = vld [vmem:[#allocation2 + $0x18] sm:$0xff]  ;;  %953 = vmatpush1.bf16.msra.mxu1 %v3032_v35 }
 0x12b   :  { %642 = vst.msk [vmem:[#allocation2 + $0x20] sm:$0xff] %vm629_vm2, %v641_v43  ;;  %v609_v49 = vadd.f32 %v564_v44, %v563_v40  ;;  %v566_v50 = vmax.f32 %v461_v45, 0.0  ;;  %954 = vmatprep.subr.bf16.mxu1 %v3037_v39  ;;  %v3470_v52 = vpack.c.bf16 %v673_v47, %v672_v25 }
 0x12d   :  { %v610_v53 = vadd.f32 %v566_v50, %v565_v46  ;;  %v464_v54 = vpop.f32.mrb[24].mxu0 }
 0x12e   :  { %v465_v55 = vadd.f32 %v464_v54, %v3412_v5  ;;  %v466_v56 = vpop.f32.mrb[25].mxu0  ;;  %955 = vmatpush1.bf16.msra.mxu1 %v3035_v48 }
 0x12f   :  { %v643_v58 = vadd.f32 %v610_v53, %v609_v49  ;;  %v467_v59 = vadd.f32 %v466_v56, %v3416_v6  ;;  %v468_v60 = vpop.f32.mrb[26].mxu0  ;;  %956 = vmatprep.subr.bf16.mxu1 %v3040_v51 }
 0x130   :  { %v567_v0 = vmax.f32 %v465_v55, 0.0  ;;  %v469_v3 = vadd.f32 %v468_v60, %v3412_v5  ;;  %v470_v7 = vpop.f32.mrb[27].mxu0 }
 0x131   :  { %v644_v8 = vmul.f32 0.25, %v643_v58  ;;  %v568_v9 = vmax.f32 %v467_v59, 0.0  ;;  %v471_v10 = vadd.f32 %v470_v7, %v3416_v6 }
 0x132   :  { %v569_v11 = vmax.f32 %v469_v3, 0.0  ;;  %v3485_v12 = vld [vmem:[#allocation2 + $0x20] sm:$0xff]  ;;  %957 = vmatpush1.bf16.msra.mxu1 %v3038_v57 }
 0x133   :  { %645 = vst.msk [vmem:[#allocation2 + $0x28] sm:$0xff] %vm629_vm2, %v644_v8  ;;  %v611_v15 = vadd.f32 %v568_v9, %v567_v0  ;;  %v570_v16 = vmax.f32 %v471_v10, 0.0  ;;  %v3492_v17 = vpack.c.bf16 %v3485_v12, %v673_v47  ;;  %958 = vmatprep.subr.bf16.mxu1 %v3043_v61 }
 0x135   :  { %v612_v19 = vadd.f32 %v570_v16, %v569_v11  ;;  %v474_v20 = vpop.f32.mrb[28].mxu0  ;;  %2501 = vmatmul.mubr.msk.bf16.gmra.mrb[4].mxu1 %vm629_vm2, %v3492_v17 }
 0x136   :  { %v475_v21 = vadd.f32 %v474_v20, %v3412_v5  ;;  %v476_v22 = vpop.f32.mrb[29].mxu0  ;;  %843 = vmatprep.mubr.bf16.mxu1 %v3138_v62  ;;  %959 = vmatpush1.bf16.msra.mxu1 %v3041_v13 }
 0x137   :  { %v646_v23 = vadd.f32 %v612_v19, %v611_v15  ;;  %v477_v25 = vadd.f32 %v476_v22, %v3416_v6  ;;  %v478_v26 = vpop.f32.mrb[30].mxu0  ;;  %2517 = vmatprep.subr.msk.bf16.mxu1 %vm784_vm1, %v2516_v14 }
 0x138   :  { %v571_v29 = vmax.f32 %v475_v21, 0.0  ;;  %v479_v30 = vadd.f32 %v478_v26, %v3412_v5  ;;  %v480_v31 = vpop.f32.mrb[31].mxu0 }
 0x139   :  { %v647_v32 = vmul.f32 0.25, %v646_v23  ;;  %v572_v33 = vmax.f32 %v477_v25, 0.0  ;;  %v481_v34 = vadd.f32 %v480_v31, %v3416_v6 }
 0x13a   :  { %v573_v35 = vmax.f32 %v479_v30, 0.0  ;;  %961 = vmatpush1.bf16.msra.mxu1 %v945_v27  ;;  %v3511_v53 = vld [vmem:[#allocation2 + $0x28] sm:$0xff] }
 0x13b   :  { %648 = vst.msk [vmem:[#allocation2 + $0x30] sm:$0xff] %vm629_vm2, %v647_v32  ;;  %v613_v36 = vadd.f32 %v572_v33, %v571_v29  ;;  %v574_v37 = vmax.f32 %v481_v34, 0.0  ;;  %1136 = vmatprep.subr.bf16.mxu1 %v3048_v28 }
 0x13d   :  { %v614_v38 = vadd.f32 %v574_v37, %v573_v35  ;;  %v484_v39 = vpop.f32.mrb[32].mxu0 }
 0x13e   :  { %v485_v40 = vadd.f32 %v484_v39, %v3412_v5  ;;  %v486_v41 = vpop.f32.mrb[33].mxu0 }
 0x13f   :  { %v649_v42 = vadd.f32 %v614_v38, %v613_v36  ;;  %v487_v43 = vadd.f32 %v486_v41, %v3416_v6  ;;  %v488_v44 = vpop.f32.mrb[34].mxu0 }
 0x140   :  { %v575_v45 = vmax.f32 %v485_v40, 0.0  ;;  %v489_v46 = vadd.f32 %v488_v44, %v3412_v5  ;;  %v490_v47 = vpop.f32.mrb[35].mxu0 }
 0x141   :  { %v650_v48 = vmul.f32 0.25, %v649_v42  ;;  %v576_v49 = vmax.f32 %v487_v43, 0.0  ;;  %v491_v50 = vadd.f32 %v490_v47, %v3416_v6 }
 0x142   :  { %v577_v51 = vmax.f32 %v489_v46, 0.0  ;;  %v3513_v54 = vld [vmem:[#allocation2 + $0x30] sm:$0xff] }
 0x143   :  { %651 = vst.msk [vmem:[#allocation2 + $0x38] sm:$0xff] %vm629_vm2, %v650_v48  ;;  %v615_v55 = vadd.f32 %v576_v49, %v575_v45  ;;  %v578_v56 = vmax.f32 %v491_v50, 0.0  ;;  %v3518_v57 = vpack.c.bf16 %v3513_v54, %v3511_v53 }
 0x145   :  { %v616_v58 = vadd.f32 %v578_v56, %v577_v51  ;;  %v494_v59 = vpop.f32.mrb[36].mxu0  ;;  %2502 = vmatmul.mubr.msk.bf16.gmra.mrb[8].mxu1 %vm629_vm2, %v3518_v57 }
 0x146   :  { %v495_v60 = vadd.f32 %v494_v59, %v3412_v5  ;;  %v496_v61 = vpop.f32.mrb[37].mxu0  ;;  %853 = vmatprep.mubr.bf16.mxu1 %v3138_v62 }
 0x147   :  { %v652_v63 = vadd.f32 %v616_v58, %v615_v55  ;;  %v497_v0 = vadd.f32 %v496_v61, %v3416_v6  ;;  %v498_v3 = vpop.f32.mrb[38].mxu0 }
 0x148   :  { %v579_v7 = vmax.f32 %v495_v60, 0.0  ;;  %v499_v8 = vadd.f32 %v498_v3, %v3412_v5  ;;  %v500_v9 = vpop.f32.mrb[39].mxu0 }
 0x149   :  { %v653_v10 = vmul.f32 0.25, %v652_v63  ;;  %v580_v11 = vmax.f32 %v497_v0, 0.0  ;;  %v501_v13 = vadd.f32 %v500_v9, %v3416_v6 }
 0x14a   :  { %v581_v14 = vmax.f32 %v499_v8, 0.0  ;;  %v3532_v33 = vld [vmem:[#allocation2 + $0x38] sm:$0xff] }
 0x14b   :  { %654 = vst.msk [vmem:[#allocation2 + $0x40] sm:$0xff] %vm629_vm2, %v653_v10  ;;  %v617_v15 = vadd.f32 %v580_v11, %v579_v7  ;;  %v582_v16 = vmax.f32 %v501_v13, 0.0 }
 0x14d   :  { %v618_v18 = vadd.f32 %v582_v16, %v581_v14  ;;  %v504_v19 = vpop.f32.mrb[40].mxu0 }
 0x14e   :  { %v505_v20 = vadd.f32 %v504_v19, %v3412_v5  ;;  %v506_v21 = vpop.f32.mrb[41].mxu0 }
 0x14f   :  { %v655_v22 = vadd.f32 %v618_v18, %v617_v15  ;;  %v507_v23 = vadd.f32 %v506_v21, %v3416_v6  ;;  %v508_v25 = vpop.f32.mrb[42].mxu0 }
 0x150   :  { %v583_v26 = vmax.f32 %v505_v20, 0.0  ;;  %v509_v27 = vadd.f32 %v508_v25, %v3412_v5  ;;  %v510_v28 = vpop.f32.mrb[43].mxu0 }
 0x151   :  { %v656_v29 = vmul.f32 0.25, %v655_v22  ;;  %v584_v30 = vmax.f32 %v507_v23, 0.0  ;;  %v511_v31 = vadd.f32 %v510_v28, %v3416_v6 }
 0x152   :  { %v585_v32 = vmax.f32 %v509_v27, 0.0  ;;  %v3534_v34 = vld [vmem:[#allocation2 + $0x40] sm:$0xff] }
 0x153   :  { %657 = vst.msk [vmem:[#allocation2 + $0x48] sm:$0xff] %vm629_vm2, %v656_v29  ;;  %v619_v35 = vadd.f32 %v584_v30, %v583_v26  ;;  %v586_v36 = vmax.f32 %v511_v31, 0.0  ;;  %v3539_v37 = vpack.c.bf16 %v3534_v34, %v3532_v33 }
 0x155   :  { %v620_v38 = vadd.f32 %v586_v36, %v585_v32  ;;  %v514_v39 = vpop.f32.mrb[44].mxu0  ;;  %2503 = vmatmul.mubr.msk.bf16.gmra.mrb[12].mxu1 %vm629_vm2, %v3539_v37 }
 0x156   :  { %v515_v40 = vadd.f32 %v514_v39, %v3412_v5  ;;  %v516_v41 = vpop.f32.mrb[45].mxu0  ;;  %863 = vmatprep.mubr.bf16.mxu1 %v3138_v62  ;;  %v3046_v39 = vld [vmem:[%s4035_s3 + $0xb0] ss:$8 sps:$4 sm:$0xff]  }
 0x157   :  { %v658_v42 = vadd.f32 %v620_v38, %v619_v35  ;;  %v517_v43 = vadd.f32 %v516_v41, %v3416_v6  ;;  %v518_v44 = vpop.f32.mrb[46].mxu0  ;;  %v670_v38 = vld [vmem:[#allocation2] sm:$0xff] }
 0x158   :  { %v587_v45 = vmax.f32 %v515_v40, 0.0  ;;  %v519_v46 = vadd.f32 %v518_v44, %v3412_v5  ;;  %v520_v47 = vpop.f32.mrb[47].mxu0  ;;  %v680_v41 = vpack.c.bf16 %v3441_v24, %v670_v38  ;;  %v3054_v24 = vld [vmem:[%s4035_s3 + $0xd4] ss:$8 sps:$4 sm:$0xff]  }
 0x159   :  { %v659_v48 = vmul.f32 0.25, %v658_v42  ;;  %v588_v49 = vmax.f32 %v517_v43, 0.0  ;;  %v521_v50 = vadd.f32 %v520_v47, %v3416_v6  ;;  %v3051_v42 = vld [vmem:[%s4035_s3 + $0xc4] ss:$8 sps:$4 sm:$0xff]   ;;  %v3052_v47 = vld [vmem:[%s4035_s3 + $0xd0] ss:$8 sps:$4 sm:$0xff]  }
 0x15a   :  { %v589_v51 = vmax.f32 %v519_v46, 0.0  ;;  %v3553_v14 = vld [vmem:[#allocation2 + $0x48] sm:$0xff] }
 0x15b   :  { %660 = vst.msk [vmem:[#allocation2 + $0x50] sm:$0xff] %vm629_vm2, %v659_v48  ;;  %v621_v55 = vadd.f32 %v588_v49, %v587_v45  ;;  %v590_v56 = vmax.f32 %v521_v50, 0.0  ;;  %v3057_v48 = vld [vmem:[%s4035_s3 + $0xe4] ss:$8 sps:$4 sm:$0xff]   ;;  %v3055_v49 = vld [vmem:[%s4035_s3 + $0xe0] ss:$8 sps:$4 sm:$0xff]  }
 0x15c   :  { %v3060_v50 = vld [vmem:[%s4035_s3 + $0xf4] ss:$8 sps:$4 sm:$0xff]  }
 0x15d   :  { %v622_v58 = vadd.f32 %v590_v56, %v589_v51  ;;  %v524_v59 = vpop.f32.mrb[48].mxu0  ;;  %v2533_v51 = vld [vmem:[%s4035_s3 + $0x100] sm:$0x33]  ;;  %v3609_v56 = vpack.c.bf16 %v3511_v53, %v3485_v12  ;;  %v3621_v12 = vpack.c.bf16 %v3532_v33, %v3513_v54  ;;  %v3139_v53 = vmov 0.0   ;;  %v3099_v54 = vld [vmem:[%s4037_s5 + $0x38] sm:$0xff]  }
 0x15e   :  { %v525_v60 = vadd.f32 %v524_v59, %v3412_v5  ;;  %v526_v61 = vpop.f32.mrb[49].mxu0  ;;  %v2544_v59 = vcombine.low %v2533_v51, %v2533_v51  ;;  %2747 = vmatprep.subr.bf16.mxu0 %v3139_v53  ;;  %v3639_v33 = vpack.c.bf16 %v3553_v14, %v3534_v34  ;;  %v3068_v34 = vld [vmem:[%s4035_s3 + $0x11c] ss:$8 sps:$4 sm:$0xff]   ;;  %2757 = vmatprep.mubr.msk.bf16.mxu0 %vm3140_vm3, %v3139_v53 }
 0x15f   :  { %v661_v63 = vadd.f32 %v622_v58, %v621_v55  ;;  %v527_v0 = vadd.f32 %v526_v61, %v3416_v6  ;;  %v528_v3 = vpop.f32.mrb[50].mxu0  ;;  %v3058_v55 = vld [vmem:[%s4035_s3 + $0xf0] ss:$8 sps:$4 sm:$0xff]   ;;  %v2545_v58 = vcombine.high %v2533_v51, %v2533_v51  ;;  %v3065_v61 = vld [vmem:[%s4035_s3 + $0x10c] ss:$8 sps:$4 sm:$0xff]  }
 0x160   :  { %v591_v7 = vmax.f32 %v525_v60, 0.0  ;;  %v529_v8 = vadd.f32 %v528_v3, %v3412_v5  ;;  %v530_v9 = vpop.f32.mrb[51].mxu0  ;;  %v1131_v60 = vsel %vm784_vm1, %v2544_v59, 0  ;;  %v3100_v3 = vld [vmem:[%s4037_s5 + $0x40] sm:$0xff]  }
 0x161   :  { %v662_v10 = vmul.f32 0.25, %v661_v63  ;;  %v592_v11 = vmax.f32 %v527_v0, 0.0  ;;  %v531_v13 = vadd.f32 %v530_v9, %v3416_v6  ;;  %v3097_v63 = vld [vmem:[%s4037_s5 + $0x28] sm:$0xff]   ;;  %v3098_v0 = vld [vmem:[%s4037_s5 + $0x30] sm:$0xff]  }
 0x162   :  { %v3555_v15 = vld [vmem:[#allocation2 + $0x50] sm:$0xff]  ;;  %v593_v16 = vmax.f32 %v529_v8, 0.0  ;;  %2748 = vmatpush3.bf16.msra.mxu0 %v3097_v63  ;;  %v3066_v8 = vld [vmem:[%s4035_s3 + $0x118] ss:$8 sps:$4 sm:$0xff]  }
 0x163   :  { %663 = vst.msk [vmem:[#allocation2 + $0x58] sm:$0xff] %vm629_vm2, %v662_v10  ;;  %v3560_v18 = vpack.c.bf16 %v3555_v15, %v3553_v14  ;;  %v623_v19 = vadd.f32 %v592_v11, %v591_v7  ;;  %v594_v20 = vmax.f32 %v531_v13, 0.0  ;;  %2749 = vmatprep.subr.bf16.mxu0 %v3139_v53  ;;  %v3063_v7 = vld [vmem:[%s4035_s3 + $0x108] ss:$8 sps:$4 sm:$0xff]   ;;  %v3071_v9 = vld [vmem:[%s4035_s3 + $0x12c] ss:$8 sps:$4 sm:$0xff]  }
 0x164   :  { %v3069_v10 = vld [vmem:[%s4035_s3 + $0x128] ss:$8 sps:$4 sm:$0xff]   ;;  %v3072_v11 = vld [vmem:[%s4035_s3 + $0x138] ss:$8 sps:$4 sm:$0xff]   ;;  %v3077_v13 = vld [vmem:[%s4035_s3 + $0x14c] ss:$8 sps:$4 sm:$0xff]  }
 0x165   :  { %2504 = vmatmul.mubr.msk.bf16.gmra.mrb[16].mxu1 %vm629_vm2, %v3560_v18  ;;  %v624_v21 = vadd.f32 %v594_v20, %v593_v16  ;;  %v534_v22 = vpop.f32.mrb[52].mxu0  ;;  %v2562_v14 = vld [vmem:[%s4035_s3 + $0x158] sm:$0x33]  ;;  %v3075_v16 = vld [vmem:[%s4035_s3 + $0x148] ss:$8 sps:$4 sm:$0xff]  }
 0x166   :  { %982 = vmatprep.mubr.bf16.mxu1 %v3138_v62  ;;  %v535_v23 = vadd.f32 %v534_v22, %v3412_v5  ;;  %v536_v25 = vpop.f32.mrb[53].mxu0  ;;  %2750 = vmatpush3.bf16.msra.mxu0 %v3098_v0  ;;  %v2573_v20 = vcombine.low %v2562_v14, %v2562_v14  ;;  %v3082_v22 = vld [vmem:[%s4035_s3 + $0x164] ss:$8 sps:$4 sm:$0xff]  }
 0x167   :  { %v664_v26 = vadd.f32 %v624_v21, %v623_v19  ;;  %v537_v27 = vadd.f32 %v536_v25, %v3416_v6  ;;  %v538_v28 = vpop.f32.mrb[54].mxu0  ;;  %2751 = vmatprep.subr.bf16.mxu0 %v3139_v53  ;;  %v2574_v19 = vcombine.high %v2562_v14, %v2562_v14 }
 0x168   :  { %v595_v29 = vmax.f32 %v535_v23, 0.0  ;;  %v539_v30 = vadd.f32 %v538_v28, %v3412_v5  ;;  %v540_v31 = vpop.f32.mrb[55].mxu0  ;;  %v1337_v21 = vsel %vm784_vm1, %v2573_v20, 0  ;;  %v3088_v28 = vld [vmem:[%s4035_s3 + $0x184] ss:$8 sps:$4 sm:$0xff]  }
 0x169   :  { %v665_v32 = vmul.f32 0.25, %v664_v26  ;;  %v596_v35 = vmax.f32 %v537_v27, 0.0  ;;  %v541_v36 = vadd.f32 %v540_v31, %v3416_v6  ;;  %v3049_v6 = vld [vmem:[%s4035_s3 + $0xc0] ss:$8 sps:$4 sm:$0xff]   ;;  %v3085_v27 = vld [vmem:[%s4035_s3 + $0x174] ss:$8 sps:$4 sm:$0xff]  }
 0x16a   :  { %v597_v40 = vmax.f32 %v539_v30, 0.0  ;;  %2752 = vmatpush3.bf16.msra.mxu0 %v3099_v54  ;;  %v1042_v23 = vld [vmem:[#allocation2 + $0x58] sm:$0xff]  ;;  %v3080_v26 = vld [vmem:[%s4035_s3 + $0x160] ss:$8 sps:$4 sm:$0xff]   ;;  %v3094_v31 = vld [vmem:[%s4035_s3 + $0x1a4] ss:$8 sps:$4 sm:$0xff]  }
 0x16b   :  { %666 = vst.msk [vmem:[#allocation2 + $0x60] sm:$0xff] %vm629_vm2, %v665_v32  ;;  %v625_v5 = vadd.f32 %v596_v35, %v595_v29  ;;  %v598_v43 = vmax.f32 %v541_v36, 0.0  ;;  %2753 = vmatprep.subr.bf16.mxu0 %v3139_v53  ;;  %v1047_v25 = vpack.c.bf16 %v1042_v23, %v3555_v15  ;;  %v3083_v15 = vld [vmem:[%s4035_s3 + $0x170] ss:$8 sps:$4 sm:$0xff]   ;;  %v3086_v29 = vld [vmem:[%s4035_s3 + $0x180] ss:$8 sps:$4 sm:$0xff]  }
 0x16c   :  { %v3089_v30 = vld [vmem:[%s4035_s3 + $0x190] ss:$8 sps:$4 sm:$0xff]  }
 0x16d   :  { %2518 = vmatmul.mubr.msk.bf16.vlgmr.msra.gmra.mrb[0].mxu1 %vm629_vm2, %v680_v41  ;;  %v626_v44 = vadd.f32 %v598_v43, %v597_v40  ;;  %v2591_v32 = vld [vmem:[%s4035_s3 + $0x1b0] sm:$0x33]  ;;  %v3101_v41 = vld [vmem:[%s4037_s5 + $0x48] sm:$0xff]   ;;  %v3110_v43 = vld [vmem:[%s4037_s5 + $0xb8] sm:$0xff]  }
 0x16e   :  { %1137 = vmatpush1.bf16.msra.mxu1 %v3046_v39  ;;  %992 = vmatprep.mubr.bf16.mxu1 %v3138_v62  ;;  %v2603_v35 = vcombine.high %v2591_v32, %v2591_v32  ;;  %v2602_v36 = vcombine.low %v2591_v32, %v2591_v32 }
 0x16f   :  { %1138 = vmatprep.subr.bf16.mxu1 %v3051_v42  ;;  %v667_v45 = vadd.f32 %v626_v44, %v625_v5  ;;  %2754 = vmatpush3.bf16.msra.mxu0 %v3100_v3  ;;  %v3106_v42 = vld [vmem:[%s4037_s5 + $0xa8] sm:$0xff]   ;;  %v3108_v5 = vld [vmem:[%s4037_s5 + $0xb0] sm:$0xff]   ;;  %v3112_v44 = vld [vmem:[%s4037_s5 + $0xc0] sm:$0xff]  }
 0x170   :  { %2755 = vmatprep.subr.bf16.mxu0 %v3139_v53  ;;  %v1543_v38 = vsel %vm784_vm1, %v2602_v36, 0 }
 0x171   :  { %v668_v46 = vmul.f32 0.25, %v667_v45 }
 0x172   :  { %1139 = vmatpush1.bf16.msra.mxu1 %v3049_v6  ;;  %v1248_v39 = vld [vmem:[#allocation2 + $0x60] sm:$0xff] }
 0x173   :  { %1140 = vmatprep.subr.bf16.mxu1 %v3054_v24  ;;  %669 = vst.msk [vmem:[#allocation2 + $0x68] sm:$0xff] %vm629_vm2, %v668_v46  ;;  %v1253_v40 = vpack.c.bf16 %v1248_v39, %v1042_v23  ;;  %2756 = vmatpush3.bf16.msra.mxu0 %v3101_v41  ;;  %v1651_v6 = vld [vmem:[%s4038_s4] sm:$0x3] }
 0x174   :  { %2761 = vmatprep.subr.bf16.mxu0 %v3139_v53  ;;  %v3792_v24 = vrot.slane %v1651_v6, %v93_v2  ;;  %v3796_v45 = vrot.slane %v1651_v6, %v97_v4  ;;  %v3105_v6 = vld [vmem:[%s4037_s5 + $0x10] sm:$0xff]  }
 0x175   :  { %2519 = vmatmul.mubr.msk.bf16.gmra.mrb[4].mxu1 %vm629_vm2, %v3470_v52 }
 0x176   :  { %1141 = vmatpush1.bf16.msra.mxu1 %v3052_v47  ;;  %1002 = vmatprep.mubr.bf16.mxu1 %v3138_v62 }
 0x177   :  { %1142 = vmatprep.subr.bf16.mxu1 %v3057_v48 }
 0x17a   :  { %1143 = vmatpush1.bf16.msra.mxu1 %v3055_v49 }
 0x17b   :  { %1144 = vmatprep.subr.bf16.mxu1 %v3060_v50 }
 0x17d   :  { %2520 = vmatmul.mubr.msk.bf16.gmra.mrb[8].mxu1 %vm629_vm2, %v3609_v56 }
 0x17e   :  { %1012 = vmatprep.mubr.bf16.mxu1 %v3138_v62  ;;  %1145 = vmatpush1.bf16.msra.mxu1 %v3058_v55 }
 0x17f   :  { %2546 = vmatprep.subr.msk.bf16.mxu1 %vm784_vm1, %v2545_v58 }
 0x182   :  { %1147 = vmatpush1.bf16.msra.mxu1 %v1131_v60 }
 0x183   :  { %1342 = vmatprep.subr.bf16.mxu1 %v3065_v61 }
 0x185   :  { %2521 = vmatmul.mubr.msk.bf16.gmra.mrb[12].mxu1 %vm629_vm2, %v3621_v12 }
 0x186   :  { %1022 = vmatprep.mubr.bf16.mxu1 %v3138_v62 }
 0x18d   :  { %2522 = vmatmul.mubr.msk.bf16.gmra.mrb[16].mxu1 %vm629_vm2, %v3639_v33 }
 0x18e   :  { %1168 = vmatprep.mubr.bf16.mxu1 %v3138_v62 }
 0x195   :  { %2547 = vmatmul.mubr.msk.bf16.vlgmr.msra.gmra.mrb[0].mxu1 %vm629_vm2, %v3470_v52  ;;  %v3074_v52 = vld [vmem:[%s4035_s3 + $0x13c] ss:$8 sps:$4 sm:$0xff]  }
 0x196   :  { %1343 = vmatpush1.bf16.msra.mxu1 %v3063_v7  ;;  %1178 = vmatprep.mubr.bf16.mxu1 %v3138_v62 }
 0x197   :  { %1344 = vmatprep.subr.bf16.mxu1 %v3068_v34 }
 0x19a   :  { %1345 = vmatpush1.bf16.msra.mxu1 %v3066_v8 }
 0x19b   :  { %1346 = vmatprep.subr.bf16.mxu1 %v3071_v9 }
 0x19d   :  { %2548 = vmatmul.mubr.msk.bf16.gmra.mrb[4].mxu1 %vm629_vm2, %v3609_v56 }
 0x19e   :  { %1347 = vmatpush1.bf16.msra.mxu1 %v3069_v10  ;;  %1188 = vmatprep.mubr.bf16.mxu1 %v3138_v62 }
 0x19f   :  { %1348 = vmatprep.subr.bf16.mxu1 %v3074_v52 }
 0x1a2   :  { %1349 = vmatpush1.bf16.msra.mxu1 %v3072_v11 }
 0x1a3   :  { %1350 = vmatprep.subr.bf16.mxu1 %v3077_v13 }
 0x1a5   :  { %2549 = vmatmul.mubr.msk.bf16.gmra.mrb[8].mxu1 %vm629_vm2, %v3621_v12 }
 0x1a6   :  { %1198 = vmatprep.mubr.bf16.mxu1 %v3138_v62  ;;  %1351 = vmatpush1.bf16.msra.mxu1 %v3075_v16 }
 0x1a7   :  { %2575 = vmatprep.subr.msk.bf16.mxu1 %vm784_vm1, %v2574_v19 }
 0x1aa   :  { %1353 = vmatpush1.bf16.msra.mxu1 %v1337_v21 }
 0x1ab   :  { %1548 = vmatprep.subr.bf16.mxu1 %v3082_v22 }
 0x1ad   :  { %2550 = vmatmul.mubr.msk.bf16.gmra.mrb[12].mxu1 %vm629_vm2, %v3639_v33 }
 0x1ae   :  { %1208 = vmatprep.mubr.bf16.mxu1 %v3138_v62 }
 0x1b5   :  { %2551 = vmatmul.mubr.msk.bf16.gmra.mrb[16].mxu1 %vm629_vm2, %v1047_v25 }
 0x1b6   :  { %1374 = vmatprep.mubr.bf16.mxu1 %v3138_v62 }
 0x1bd   :  { %2576 = vmatmul.mubr.msk.bf16.vlgmr.msra.gmra.mrb[0].mxu1 %vm629_vm2, %v3492_v17  ;;  %v3091_v17 = vld [vmem:[%s4035_s3 + $0x194] ss:$8 sps:$4 sm:$0xff]  }
 0x1be   :  { %1549 = vmatpush1.bf16.msra.mxu1 %v3080_v26  ;;  %1384 = vmatprep.mubr.bf16.mxu1 %v3138_v62 }
 0x1bf   :  { %1550 = vmatprep.subr.bf16.mxu1 %v3085_v27 }
 0x1c2   :  { %1551 = vmatpush1.bf16.msra.mxu1 %v3083_v15 }
 0x1c3   :  { %1552 = vmatprep.subr.bf16.mxu1 %v3088_v28 }
 0x1c5   :  { %2577 = vmatmul.mubr.msk.bf16.gmra.mrb[4].mxu1 %vm629_vm2, %v3518_v57  ;;  %v3092_v57 = vld [vmem:[%s4035_s3 + $0x1a0] ss:$8 sps:$4 sm:$0xff]  }
 0x1c6   :  { %1553 = vmatpush1.bf16.msra.mxu1 %v3086_v29  ;;  %1394 = vmatprep.mubr.bf16.mxu1 %v3138_v62 }
 0x1c7   :  { %1554 = vmatprep.subr.bf16.mxu1 %v3091_v17  ;;  %v3102_v17 = vld [vmem:[%s4037_s5] sm:$0xff]  }
 0x1ca   :  { %1555 = vmatpush1.bf16.msra.mxu1 %v3089_v30 }
 0x1cb   :  { %1556 = vmatprep.subr.bf16.mxu1 %v3094_v31 }
 0x1cd   :  { %2578 = vmatmul.mubr.msk.bf16.gmra.mrb[8].mxu1 %vm629_vm2, %v3539_v37  ;;  %v1454_v37 = vld [vmem:[#allocation2 + $0x68] sm:$0xff] }
 0x1ce   :  { %1404 = vmatprep.mubr.bf16.mxu1 %v3138_v62  ;;  %1557 = vmatpush1.bf16.msra.mxu1 %v3092_v57 }
 0x1cf   :  { %2604 = vmatprep.subr.msk.bf16.mxu1 %vm784_vm1, %v2603_v35 }
 0x1d2   :  { %1559 = vmatpush1.bf16.msra.mxu1 %v1543_v38 }
 0x1d3   :  { %2803 = vmatprep.subr.bf16.mxu1 %v3139_v53 }
 0x1d5   :  { %2579 = vmatmul.mubr.msk.bf16.gmra.mrb[12].mxu1 %vm629_vm2, %v3560_v18  ;;  %v1459_v18 = vpack.c.bf16 %v1454_v37, %v1248_v39  ;;  %v3103_v39 = vld [vmem:[%s4037_s5 + $0x8] sm:$0xff]  }
 0x1d6   :  { %1414 = vmatprep.mubr.bf16.mxu1 %v3138_v62 }
 0x1dd   :  { %2580 = vmatmul.mubr.msk.bf16.gmra.mrb[16].mxu1 %vm629_vm2, %v1253_v40 }
 0x1de   :  { %1580 = vmatprep.mubr.bf16.mxu1 %v3138_v62 }
 0x1e5   :  { %2605 = vmatmul.mubr.msk.bf16.vlgmr.msra.gmra.mrb[0].mxu1 %vm629_vm2, %v3609_v56 }
 0x1e6   :  { %1590 = vmatprep.mubr.bf16.mxu1 %v3138_v62 }
 0x1ed   :  { %2606 = vmatmul.mubr.msk.bf16.gmra.mrb[4].mxu1 %vm629_vm2, %v3621_v12 }
 0x1ee   :  { %1600 = vmatprep.mubr.bf16.mxu1 %v3138_v62 }
 0x1f5   :  { %2607 = vmatmul.mubr.msk.bf16.gmra.mrb[8].mxu1 %vm629_vm2, %v3639_v33 }
 0x1f6   :  { %1610 = vmatprep.mubr.bf16.mxu1 %v3138_v62 }
 0x1fd   :  { %2608 = vmatmul.mubr.msk.bf16.gmra.mrb[12].mxu1 %vm629_vm2, %v1047_v25 }
 0x1fe   :  { %1620 = vmatprep.mubr.bf16.mxu1 %v3138_v62  ;;  %v3104_v62 = vld [vmem:[%s4037_s5 + $0xa0] sm:$0xff]  }
 0x1ff   :  { %2804 = vmatpush3.bf16.msra.mxu1 %v3104_v62 }
 0x200   :  { %2805 = vmatprep.subr.bf16.mxu1 %v3139_v53 }
 0x203   :  { %2806 = vmatpush3.bf16.msra.mxu1 %v3106_v42 }
 0x204   :  { %2807 = vmatprep.subr.bf16.mxu1 %v3139_v53 }
 0x205   :  { %2609 = vmatmul.mubr.msk.bf16.gmra.mrb[16].mxu1 %vm629_vm2, %v1459_v18 }
 0x206   :  { %2813 = vmatprep.mubr.msk.bf16.mxu1 %vm3140_vm3, %v3139_v53 }
 0x207   :  { %2808 = vmatpush3.bf16.msra.mxu1 %v3108_v5 }
 0x208   :  { %2809 = vmatprep.subr.bf16.mxu1 %v3139_v53 }
 0x20b   :  { %2810 = vmatpush3.bf16.msra.mxu1 %v3110_v43 }
 0x20c   :  { %2811 = vmatprep.subr.bf16.mxu1 %v3139_v53 }
 0x20f   :  { %2812 = vmatpush3.bf16.msra.mxu1 %v3112_v44 }
 0x210   :  { %2837 = vmatprep.subr.bf16.mxu1 %v3139_v53 }
 0x2b8   :  { %v1582_v46 = vpop.f32.mrb[0].mxu1 }
 0x2b9   :  { %v1663_v47 = vadd.f32 %v3792_v24, %v1582_v46  ;;  %v1584_v48 = vpop.f32.mrb[1].mxu1 }
 0x2ba   :  { %v1664_v49 = vadd.f32 %v3796_v45, %v1584_v48  ;;  %v1586_v50 = vpop.f32.mrb[2].mxu1 }
 0x2bb   :  { %v1683_v51 = vmax.f32 %v1663_v47, 0.0  ;;  %v1665_v55 = vadd.f32 %v3792_v24, %v1586_v50  ;;  %v1588_v56 = vpop.f32.mrb[3].mxu1 }
 0x2bc   :  { %v1684_v58 = vmax.f32 %v1664_v49, 0.0  ;;  %v1666_v59 = vadd.f32 %v3796_v45, %v1588_v56 }
 0x2bd   :  { %1703 = vst [vmem:[%s4039_s11] sm:$0xff] %v1683_v51  ;;  %v1685_v1 = vmax.f32 %v1665_v55, 0.0  ;;  %v3107_v55 = vld [vmem:[%s4037_s5 + $0x18] sm:$0xff]  }
 0x2be   :  { %1704 = vst [vmem:[%s4039_s11 + $0x8] sm:$0xff] %v1684_v58  ;;  %v1723_v2 = vadd.f32 %v1684_v58, %v1683_v51  ;;  %v1686_v4 = vmax.f32 %v1666_v59, 0.0 }
 0x2bf   :  { %1705 = vst [vmem:[%s4039_s11 + $0x10] sm:$0xff] %v1685_v1 }
 0x2c0   :  { %1706 = vst [vmem:[%s4039_s11 + $0x18] sm:$0xff] %v1686_v4  ;;  %v1724_v60 = vadd.f32 %v1686_v4, %v1685_v1  ;;  %v1592_v61 = vpop.f32.mrb[4].mxu1 }
 0x2c1   :  { %v1667_v12 = vadd.f32 %v3792_v24, %v1592_v61  ;;  %v1594_v63 = vpop.f32.mrb[5].mxu1 }
 0x2c2   :  { %v3815_v0 = vadd.f32 %v1724_v60, %v1723_v2  ;;  %v1668_v54 = vadd.f32 %v3796_v45, %v1594_v63  ;;  %v1596_v33 = vpop.f32.mrb[6].mxu1  ;;  %v3109_v63 = vld [vmem:[%s4037_s5 + $0x20] sm:$0xff]  }
 0x2c3   :  { %v1687_v3 = vmax.f32 %v1667_v12, 0.0  ;;  %v1669_v7 = vadd.f32 %v3792_v24, %v1596_v33  ;;  %v1598_v34 = vpop.f32.mrb[7].mxu1 }
 0x2c4   :  { %v1688_v8 = vmax.f32 %v1668_v54, 0.0  ;;  %v1670_v9 = vadd.f32 %v3796_v45, %v1598_v34  ;;  %v1734_v54 = vmul.f32 0.25, %v3815_v0  ;;  %v3111_v0 = vld [vmem:[%s4037_s5 + $0x50] sm:$0xff]  }
 0x2c5   :  { %1707 = vst [vmem:[%s4039_s11 + $0x20] sm:$0xff] %v1687_v3  ;;  %v1689_v10 = vmax.f32 %v1669_v7, 0.0 }
 0x2c6   :  { %1708 = vst [vmem:[%s4039_s11 + $0x28] sm:$0xff] %v1688_v8  ;;  %v1725_v52 = vadd.f32 %v1688_v8, %v1687_v3  ;;  %v1690_v11 = vmax.f32 %v1670_v9, 0.0  ;;  %v1735_v3 = vpack.c.bf16 %v1734_v54, %v1734_v54  ;;  %v3113_v8 = vld [vmem:[%s4037_s5 + $0x58] sm:$0xff]  }
 0x2c7   :  { %1709 = vst [vmem:[%s4039_s11 + $0x30] sm:$0xff] %v1689_v10 }
 0x2c8   :  { %1710 = vst [vmem:[%s4039_s11 + $0x38] sm:$0xff] %v1690_v11  ;;  %v1726_v13 = vadd.f32 %v1690_v11, %v1689_v10  ;;  %v1602_v14 = vpop.f32.mrb[8].mxu1  ;;  %v3114_v10 = vld [vmem:[%s4037_s5 + $0x60] sm:$0xff]   ;;  %v3116_v11 = vld [vmem:[%s4037_s5 + $0x70] sm:$0xff]  }
 0x2c9   :  { %v1671_v16 = vadd.f32 %v3792_v24, %v1602_v14  ;;  %v1604_v19 = vpop.f32.mrb[9].mxu1  ;;  %v3117_v14 = vld [vmem:[%s4037_s5 + $0x78] sm:$0xff]  }
 0x2ca   :  { %v1746_v20 = vadd.f32 %v1726_v13, %v1725_v52  ;;  %v1672_v21 = vadd.f32 %v3796_v45, %v1604_v19  ;;  %v1606_v22 = vpop.f32.mrb[10].mxu1  ;;  %v3115_v52 = vld [vmem:[%s4037_s5 + $0x68] sm:$0xff]   ;;  %v3118_v19 = vld [vmem:[%s4037_s5 + $0x80] sm:$0xff]  }
 0x2cb   :  { %v1691_v23 = vmax.f32 %v1671_v16, 0.0  ;;  %v1673_v25 = vadd.f32 %v3792_v24, %v1606_v22  ;;  %v1608_v26 = vpop.f32.mrb[11].mxu1  ;;  %v3121_v22 = vld [vmem:[%s4037_s5 + $0x98] sm:$0xff]  }
 0x2cc   :  { %v1747_v27 = vmul.f32 0.25, %v1746_v20  ;;  %v1692_v15 = vmax.f32 %v1672_v21, 0.0  ;;  %v1674_v28 = vadd.f32 %v3796_v45, %v1608_v26  ;;  %v3119_v20 = vld [vmem:[%s4037_s5 + $0x88] sm:$0xff]   ;;  %v3120_v21 = vld [vmem:[%s4037_s5 + $0x90] sm:$0xff]   ;;  %v3122_v26 = vld [vmem:[%s4040_s7] sm:$0xff]  }
 0x2cd   :  { %1711 = vst [vmem:[%s4039_s11 + $0x40] sm:$0xff] %v1691_v23  ;;  %v1693_v29 = vmax.f32 %v1673_v25, 0.0 }
 0x2ce   :  { %v1748_v30 = vpack.c.bf16 %v1747_v27, %v1747_v27  ;;  %1712 = vst [vmem:[%s4039_s11 + $0x48] sm:$0xff] %v1692_v15  ;;  %v1727_v31 = vadd.f32 %v1692_v15, %v1691_v23  ;;  %v1694_v32 = vmax.f32 %v1674_v28, 0.0  ;;  %v3123_v27 = vld [vmem:[%s4040_s7 + $0x8] sm:$0xff]   ;;  %v3124_v15 = vld [vmem:[%s4040_s7 + $0x10] sm:$0xff]   ;;  %v3125_v28 = vld [vmem:[%s4040_s7 + $0x18] sm:$0xff]  }
 0x2cf   :  { %1713 = vst [vmem:[%s4039_s11 + $0x50] sm:$0xff] %v1693_v29 }
 0x2d0   :  { %1714 = vst [vmem:[%s4039_s11 + $0x58] sm:$0xff] %v1694_v32  ;;  %v1728_v57 = vadd.f32 %v1694_v32, %v1693_v29  ;;  %v1612_v35 = vpop.f32.mrb[12].mxu1  ;;  %2758 = vmatmul.mubr.msk.bf16.vlgmr.msra.gmra.mrb[56].mxu0 %vm1790_vm4, %v1748_v30  ;;  %v3126_v29 = vld [vmem:[%s4040_s7 + $0x20] sm:$0xff]   ;;  %v3128_v30 = vld [vmem:[%s4040_s7 + $0x30] sm:$0xff]  }
 0x2d1   :  { %v1675_v36 = vadd.f32 %v3792_v24, %v1612_v35  ;;  %2762 = vmatpush3.bf16.msra.mxu0 %v3102_v17  ;;  %v1614_v38 = vpop.f32.mrb[13].mxu1  ;;  %2771 = vmatprep.mubr.msk.bf16.mxu0 %vm3140_vm3, %v3139_v53  ;;  %v3127_v17 = vld [vmem:[%s4040_s7 + $0x28] sm:$0xff]   ;;  %v3130_v32 = vld [vmem:[%s4041_s9] sm:$0xff]   ;;  %v3132_v35 = vld [vmem:[%s4041_s9 + $0x10] sm:$0xff]  }
 0x2d2   :  { %v3858_v40 = vadd.f32 %v1728_v57, %v1727_v31  ;;  %v1676_v37 = vadd.f32 %v3796_v45, %v1614_v38  ;;  %v1616_v18 = vpop.f32.mrb[14].mxu1  ;;  %2763 = vmatprep.subr.bf16.mxu0 %v3139_v53  ;;  %v3129_v31 = vld [vmem:[%s4040_s7 + $0x38] sm:$0xff]   ;;  %v3131_v57 = vld [vmem:[%s4041_s9 + $0x8] sm:$0xff]   ;;  %v3134_v38 = vld [vmem:[%s4041_s9 + $0x20] sm:$0xff]  }
 0x2d3   :  { %v1695_v41 = vmax.f32 %v1675_v36, 0.0  ;;  %v1677_v62 = vadd.f32 %v3792_v24, %v1616_v18  ;;  %v1618_v42 = vpop.f32.mrb[15].mxu1  ;;  %v3133_v36 = vld [vmem:[%s4041_s9 + $0x18] sm:$0xff]  }
 0x2d4   :  { %v1696_v5 = vmax.f32 %v1676_v37, 0.0  ;;  %v1678_v43 = vadd.f32 %v3796_v45, %v1618_v42  ;;  %v1908_v13 = vmul.f32 0.25, %v3858_v40 }
 0x2d5   :  { %1715 = vst [vmem:[%s4039_s11 + $0x60] sm:$0xff] %v1695_v41  ;;  %v1697_v44 = vmax.f32 %v1677_v62, 0.0  ;;  %2764 = vmatpush3.bf16.msra.mxu0 %v3103_v39  ;;  %v3135_v39 = vld [vmem:[%s4041_s9 + $0x28] sm:$0xff]  }
 0x2d6   :  { %1716 = vst [vmem:[%s4039_s11 + $0x68] sm:$0xff] %v1696_v5  ;;  %v1729_v46 = vadd.f32 %v1696_v5, %v1695_v41  ;;  %v1698_v47 = vmax.f32 %v1678_v43, 0.0  ;;  %2765 = vmatprep.subr.bf16.mxu0 %v3139_v53  ;;  %v1909_v16 = vpack.c.bf16 %v1908_v13, %v1908_v13 }
 0x2d7   :  { %1717 = vst [vmem:[%s4039_s11 + $0x70] sm:$0xff] %v1697_v44 }
 0x2d8   :  { %1718 = vst [vmem:[%s4039_s11 + $0x78] sm:$0xff] %v1698_v47  ;;  %v1730_v48 = vadd.f32 %v1698_v47, %v1697_v44  ;;  %v1622_v49 = vpop.f32.mrb[16].mxu1 }
 0x2d9   :  { %v1679_v50 = vadd.f32 %v3792_v24, %v1622_v49  ;;  %2766 = vmatpush3.bf16.msra.mxu0 %v3105_v6  ;;  %v1624_v51 = vpop.f32.mrb[17].mxu1 }
 0x2da   :  { %v1995_v56 = vadd.f32 %v1730_v48, %v1729_v46  ;;  %v1680_v58 = vadd.f32 %v3796_v45, %v1624_v51  ;;  %v1626_v59 = vpop.f32.mrb[18].mxu1  ;;  %2767 = vmatprep.subr.bf16.mxu0 %v3139_v53 }
 0x2db   :  { %v1699_v1 = vmax.f32 %v1679_v50, 0.0  ;;  %v1681_v2 = vadd.f32 %v3792_v24, %v1626_v59  ;;  %v1628_v4 = vpop.f32.mrb[19].mxu1 }
 0x2dc   :  { %v1700_v60 = vmax.f32 %v1680_v58, 0.0  ;;  %v1682_v61 = vadd.f32 %v3796_v45, %v1628_v4  ;;  %v1996_v23 = vmul.f32 0.25, %v1995_v56 }
 0x2dd   :  { %1719 = vst [vmem:[%s4039_s11 + $0x80] sm:$0xff] %v1699_v1  ;;  %v1701_v12 = vmax.f32 %v1681_v2, 0.0  ;;  %2768 = vmatpush3.bf16.msra.mxu0 %v3107_v55  ;;  %v2680_v2 = vld [vmem:[%s4042_s6] ss:$0 sm:$0xff] }
 0x2de   :  { %1720 = vst [vmem:[%s4039_s11 + $0x88] sm:$0xff] %v1700_v60  ;;  %v1731_v24 = vadd.f32 %v1700_v60, %v1699_v1  ;;  %v1702_v33 = vmax.f32 %v1682_v61, 0.0  ;;  %2769 = vmatprep.subr.bf16.mxu0 %v3139_v53  ;;  %v1997_v25 = vpack.c.bf16 %v1996_v23, %v1996_v23 }
 0x2df   :  { %1721 = vst [vmem:[%s4039_s11 + $0x90] sm:$0xff] %v1701_v12 }
 0x2e0   :  { %1722 = vst [vmem:[%s4039_s11 + $0x98] sm:$0xff] %v1702_v33  ;;  %v1732_v45 = vadd.f32 %v1702_v33, %v1701_v12  ;;  %v3137_v33 = vld [vmem:[%s4041_s9 + $0x38] sm:$0xff]  }
 0x2e1   :  { %2770 = vmatpush3.bf16.msra.mxu0 %v3109_v63 }
 0x2e2   :  { %v2083_v7 = vadd.f32 %v1732_v45, %v1731_v24  ;;  %2775 = vmatprep.subr.bf16.mxu0 %v3139_v53  ;;  %v3136_v24 = vld [vmem:[%s4041_s9 + $0x30] sm:$0xff]   ;;  %v2681_v45 = vld [vmem:[%s4043_s8] ss:$0 sm:$0xff] }
 0x2e4   :  { %v2084_v34 = vmul.f32 0.25, %v2083_v7  ;;  %2772 = vmatmul.mubr.msk.bf16.vlgmr.msra.gmra.mrb[60].mxu0 %vm1790_vm4, %v1735_v3 }
 0x2e5   :  { %2776 = vmatpush3.bf16.msra.mxu0 %v3111_v0  ;;  %2785 = vmatprep.mubr.msk.bf16.mxu0 %vm3140_vm3, %v3139_v53 }
 0x2e6   :  { %v2085_v9 = vpack.c.bf16 %v2084_v34, %v2084_v34  ;;  %2777 = vmatprep.subr.bf16.mxu0 %v3139_v53 }
 0x2e8   :  { %2814 = vmatmul.mubr.msk.bf16.vlgmr.msra.gmra.mrb[20].mxu1 %vm1790_vm4, %v2085_v9 }
 0x2e9   :  { %2778 = vmatpush3.bf16.msra.mxu0 %v3113_v8  ;;  %2853 = vmatprep.mubr.msk.bf16.mxu1 %vm3140_vm3, %v3139_v53 }
 0x2ea   :  { %2779 = vmatprep.subr.bf16.mxu0 %v3139_v53  ;;  %2838 = vmatpush3.bf16.msra.mxu1 %v3130_v32 }
 0x2eb   :  { %2839 = vmatprep.subr.bf16.mxu1 %v3139_v53 }
 0x2ed   :  { %2780 = vmatpush3.bf16.msra.mxu0 %v3114_v10 }
 0x2ee   :  { %2781 = vmatprep.subr.bf16.mxu0 %v3139_v53  ;;  %2840 = vmatpush3.bf16.msra.mxu1 %v3131_v57 }
 0x2ef   :  { %2841 = vmatprep.subr.bf16.mxu1 %v3139_v53 }
 0x2f1   :  { %2782 = vmatpush3.bf16.msra.mxu0 %v3115_v52 }
 0x2f2   :  { %2783 = vmatprep.subr.bf16.mxu0 %v3139_v53  ;;  %2842 = vmatpush3.bf16.msra.mxu1 %v3132_v35 }
 0x2f3   :  { %2843 = vmatprep.subr.bf16.mxu1 %v3139_v53 }
 0x2f5   :  { %2784 = vmatpush3.bf16.msra.mxu0 %v3116_v11 }
 0x2f6   :  { %2789 = vmatprep.subr.bf16.mxu0 %v3139_v53  ;;  %2844 = vmatpush3.bf16.msra.mxu1 %v3133_v36 }
 0x2f7   :  { %2845 = vmatprep.subr.bf16.mxu1 %v3139_v53 }
 0x2f8   :  { %2786 = vmatmul.mubr.msk.bf16.vlgmr.msra.gmra.mrb[64].mxu0 %vm1790_vm4, %v1909_v16 }
 0x2f9   :  { %2790 = vmatpush3.bf16.msra.mxu0 %v3117_v14  ;;  %2799 = vmatprep.mubr.msk.bf16.mxu0 %vm3140_vm3, %v3139_v53 }
 0x2fa   :  { %2791 = vmatprep.subr.bf16.mxu0 %v3139_v53  ;;  %2846 = vmatpush3.bf16.msra.mxu1 %v3134_v38 }
 0x2fb   :  { %2847 = vmatprep.subr.bf16.mxu1 %v3139_v53 }
 0x2fd   :  { %2792 = vmatpush3.bf16.msra.mxu0 %v3118_v19 }
 0x2fe   :  { %2793 = vmatprep.subr.bf16.mxu0 %v3139_v53  ;;  %2848 = vmatpush3.bf16.msra.mxu1 %v3135_v39 }
 0x2ff   :  { %2849 = vmatprep.subr.bf16.mxu1 %v3139_v53 }
 0x301   :  { %2794 = vmatpush3.bf16.msra.mxu0 %v3119_v20 }
 0x302   :  { %2795 = vmatprep.subr.bf16.mxu0 %v3139_v53  ;;  %2850 = vmatpush3.bf16.msra.mxu1 %v3136_v24 }
 0x303   :  { %2851 = vmatprep.subr.bf16.mxu1 %v3139_v53 }
 0x305   :  { %2796 = vmatpush3.bf16.msra.mxu0 %v3120_v21 }
 0x306   :  { %2797 = vmatprep.subr.bf16.mxu0 %v3139_v53  ;;  %2852 = vmatpush3.bf16.msra.mxu1 %v3137_v33 }
 0x309   :  { %2798 = vmatpush3.bf16.msra.mxu0 %v3121_v22 }
 0x30a   :  { %2817 = vmatprep.subr.bf16.mxu0 %v3139_v53 }
 0x30c   :  { %2800 = vmatmul.mubr.msk.bf16.vlgmr.msra.gmra.mrb[68].mxu0 %vm1790_vm4, %v1997_v25 }
 0x30d   :  { %2833 = vmatprep.mubr.msk.bf16.mxu0 %vm3140_vm3, %v3139_v53  ;;  %2818 = vmatpush3.bf16.msra.mxu0 %v3122_v26 }
 0x30e   :  { %2819 = vmatprep.subr.bf16.mxu0 %v3139_v53 }
 0x311   :  { %2820 = vmatpush3.bf16.msra.mxu0 %v3123_v27 }
 0x312   :  { %2821 = vmatprep.subr.bf16.mxu0 %v3139_v53 }
 0x315   :  { %2822 = vmatpush3.bf16.msra.mxu0 %v3124_v15 }
 0x316   :  { %2823 = vmatprep.subr.bf16.mxu0 %v3139_v53 }
 0x319   :  { %2824 = vmatpush3.bf16.msra.mxu0 %v3125_v28 }
 0x31a   :  { %2825 = vmatprep.subr.bf16.mxu0 %v3139_v53 }
 0x31d   :  { %2826 = vmatpush3.bf16.msra.mxu0 %v3126_v29 }
 0x31e   :  { %2827 = vmatprep.subr.bf16.mxu0 %v3139_v53 }
 0x321   :  { %2828 = vmatpush3.bf16.msra.mxu0 %v3127_v17 }
 0x322   :  { %2829 = vmatprep.subr.bf16.mxu0 %v3139_v53 }
 0x325   :  { %2830 = vmatpush3.bf16.msra.mxu0 %v3128_v30 }
 0x326   :  { %2831 = vmatprep.subr.bf16.mxu0 %v3139_v53  ;;  %v2690_v53 = vld [vmem:[%s4044_s10] ss:$0 sm:$0xff] }
 0x329   :  { %2832 = vmatpush3.bf16.msra.mxu0 %v3129_v31 }
 0x3a3   :  { %v1828_v40 = vpop.f32.mrb[56].mxu0 }
 0x3a4   :  { %v2759_v37 = vpop.f32.mrb[57].mxu0 }
 0x3a5   :  { %v1831_v18 = vpop.f32.mrb[58].mxu0 }
 0x3a6   :  { %v2760_v41 = vpop.f32.mrb[59].mxu0 }
 0x3b7   :  { %v1901_v62 = vpop.f32.mrb[60].mxu0 }
 0x3b8   :  { %v1902_v42 = vadd.f32 %v1901_v62, %v1828_v40  ;;  %v2773_v5 = vpop.f32.mrb[61].mxu0 }
 0x3b9   :  { %v1904_v43 = vpop.f32.mrb[62].mxu0 }
 0x3ba   :  { %v2774_v44 = vpop.f32.mrb[63].mxu0 }
 0x3bb   :  { %v2164_v6 = vpop.f32.mrb[20].mxu1 }
 0x3bc   :  { %v2815_v46 = vpop.f32.mrb[21].mxu1 }
 0x3bd   :  { %v2167_v47 = vpop.f32.mrb[22].mxu1 }
 0x3be   :  { %v2816_v48 = vpop.f32.mrb[23].mxu1 }
 0x3cb   :  { %v1988_v49 = vpop.f32.mrb[64].mxu0 }
 0x3cc   :  { %v1994_v50 = vadd.f32 %v1988_v49, %v1902_v42  ;;  %v2787_v51 = vpop.f32.mrb[65].mxu0 }
 0x3cd   :  { %v1991_v55 = vpop.f32.mrb[66].mxu0 }
 0x3ce   :  { %v2788_v56 = vpop.f32.mrb[67].mxu0 }
 0x3df   :  { %v2076_v58 = vpop.f32.mrb[68].mxu0 }
 0x3e0   :  { %v2082_v59 = vadd.f32 %v2076_v58, %v1994_v50  ;;  %v2801_v1 = vpop.f32.mrb[69].mxu0 }
 0x3e1   :  { %v2079_v4 = vpop.f32.mrb[70].mxu0 }
 0x3e2   :  { %v2170_v60 = vadd.f32 %v2164_v6, %v2082_v59  ;;  %v2802_v61 = vpop.f32.mrb[71].mxu0 }
 0x3e4   :  { %v2178_v12 = vadd.f32 %v2680_v2, %v2170_v60 }
 0x3e6   :  { %v2179_v63 = vmax.f32 %v2178_v12, 0.0 }
 0x3e8   :  { %v2180_v54 = vpack.c.bf16 %v2179_v63, %v2179_v63 }
 0x3ea   :  { %2834 = vmatmul.mubr.bf16.vlgmr.msra.gmra.mrb[72].mxu0 %v2180_v54 }
 0x4bd   :  { %v2286_v0 = vpop.f32.mrb[72].mxu0 }
 0x4be   :  { %v2287_v3 = vadd.f32 %v2681_v45, %v2286_v0  ;;  %v2835_v7 = vpop.f32.mrb[73].mxu0 }
 0x4bf   :  { %v2289_v34 = vpop.f32.mrb[74].mxu0 }
 0x4c0   :  { %v2292_v8 = vmax.f32 %v2287_v3, 0.0  ;;  %v2836_v9 = vpop.f32.mrb[75].mxu0 }
 0x4c2   :  { %v2293_v10 = vpack.c.bf16 %v2292_v8, %v2292_v8 }
 0x4c4   :  { %2854 = vmatmul.mubr.bf16.vlgmr.msra.gmra.mrb[24].mxu1 %v2293_v10 }
 0x597   :  { %v2399_v52 = vpop.f32.mrb[24].mxu1 }
 0x598   :  { %v2400_v11 = vadd.f32 %v2690_v53, %v2399_v52  ;;  %v2855_v13 = vpop.f32.mrb[25].mxu1 }
 0x599   :  { %v2402_v14 = vpop.f32.mrb[26].mxu1 }
 0x59a   :  { %2405 = vst [vmem:[%s4045_s12] sm:$0xff] %v2400_v11  ;;  %v2856_v16 = vpop.f32.mrb[27].mxu1 }

</bundles_post_ra>
